<compile_context>
chip_gen: v7x
topology: tpu7x:2x2x1
jax: 0.10.0
libtpu: 0.0.40
codegen_flags: <defaults>
</compile_context>

<pallas_src>
import functools

import jax
import jax.numpy as jnp
from jax.experimental import pallas as pl
from jax.experimental.pallas import tpu as pltpu


# -----------------------------------------------------------------------------
# Pallas kernel
# -----------------------------------------------------------------------------
def _block_kernel(*refs, num_heads, head_dim, eps, has_mask, bblk, seq):
    if has_mask:
        (x_ref, mask_ref,
         ln1w_ref, ln1b_ref,
         wq_ref, bq_ref, wk_ref, bk_ref, wv_ref, bv_ref,
         wp_ref, bp_ref,
         ln2w_ref, ln2b_ref,
         w1_ref, b1_ref, w2_ref, b2_ref,
         g1_ref, g2_ref,
         o_ref) = refs
    else:
        (x_ref,
         ln1w_ref, ln1b_ref,
         wq_ref, bq_ref, wk_ref, bk_ref, wv_ref, bv_ref,
         wp_ref, bp_ref,
         ln2w_ref, ln2b_ref,
         w1_ref, b1_ref, w2_ref, b2_ref,
         g1_ref, g2_ref,
         o_ref) = refs
        mask_ref = None

    d = head_dim
    N = bblk * seq
    E = num_heads * d

    # (Bblk, T, E) -> (Bblk*T, E): all row-wise math (LN / qkv / proj / MLP)
    # runs on one big slab so the MXU sees Bblk*T rows per grid step.
    x = x_ref[...].reshape(N, E)                       # f32

    # ---- LayerNorm 1 (f32) ----
    mu = jnp.mean(x, axis=-1, keepdims=True)
    var = jnp.mean((x - mu) ** 2, axis=-1, keepdims=True)
    xn = (x - mu) * jax.lax.rsqrt(var + eps)
    xn = xn * ln1w_ref[...] + ln1b_ref[...]
    xn_bf = xn.astype(jnp.bfloat16)                    # MXU operand

    mask = mask_ref[...] if has_mask else None         # (T, T) additive, f32

    # ---- attention: static unroll over heads, accumulate into output proj ----
    y = jnp.zeros((N, E), jnp.float32)
    for h in range(num_heads):
        lo = h * d
        xh = xn_bf[:, lo:lo + d]                       # (N, d) bf16

        # scale is already folded into wq / bq in the wrapper.
        qh = jnp.dot(xh, wq_ref[h], preferred_element_type=jnp.float32) \
            + bq_ref[:, lo:lo + d]
        kh = jnp.dot(xh, wk_ref[h], preferred_element_type=jnp.float32) \
            + bk_ref[:, lo:lo + d]
        vh = jnp.dot(xh, wv_ref[h], preferred_element_type=jnp.float32) \
            + bv_ref[:, lo:lo + d]

        qh = qh.reshape(bblk, seq, d).astype(jnp.bfloat16)
        kh = kh.reshape(bblk, seq, d).astype(jnp.bfloat16)
        vh = vh.reshape(bblk, seq, d).astype(jnp.bfloat16)

        s = jnp.einsum('bqd,bkd->bqk', qh, kh,
                       preferred_element_type=jnp.float32)   # (Bblk, T, T) f32
        if has_mask:
            s = s + mask
        s = s - jnp.max(s, axis=-1, keepdims=True)
        p = jnp.exp(s)
        p = p * pl.reciprocal(jnp.sum(p, axis=-1, keepdims=True), approx=True)

        oh = jnp.einsum('bqk,bkd->bqd', p.astype(jnp.bfloat16), vh,
                        preferred_element_type=jnp.float32)  # (Bblk, T, d)
        # fold this head's contribution straight into proj (no concatenate)
        y = y + jnp.dot(oh.reshape(N, d).astype(jnp.bfloat16),
                        wp_ref[lo:lo + d, :],
                        preferred_element_type=jnp.float32)

    y = y + bp_ref[...]
    x1 = x + g1_ref[...] * y                           # residual + layer-scale 1

    # ---- LayerNorm 2 + MLP (exact erf GELU, matching nn.GELU default) ----
    mu2 = jnp.mean(x1, axis=-1, keepdims=True)
    var2 = jnp.mean((x1 - mu2) ** 2, axis=-1, keepdims=True)
    x2n = (x1 - mu2) * jax.lax.rsqrt(var2 + eps)
    x2n = x2n * ln2w_ref[...] + ln2b_ref[...]

    h1 = jnp.dot(x2n.astype(jnp.bfloat16), w1_ref[...],
                 preferred_element_type=jnp.float32) + b1_ref[...]
    h1 = 0.5 * h1 * (1.0 + jax.lax.erf(h1 * (1.0 / jnp.sqrt(2.0))))
    h2 = jnp.dot(h1.astype(jnp.bfloat16), w2_ref[...],
                 preferred_element_type=jnp.float32) + b2_ref[...]

    out = x1 + g2_ref[...] * h2                        # residual + layer-scale 2
    o_ref[...] = out.reshape(bblk, seq, E)


# -----------------------------------------------------------------------------
# Parameter setup (deterministic synthetic init; shapes follow the nn.Module)
# -----------------------------------------------------------------------------
def init_params(key, dim, num_heads, mlp_ratio=4.0, layer_scale_init=0.1):
    d = dim // num_heads
    hid = int(dim * mlp_ratio)
    ks = jax.random.split(key, 6)

    def lin(k, out_f, in_f):
        kw, kb = jax.random.split(k)
        w = jax.random.normal(kw, (out_f, in_f), jnp.float32) * 0.05   # torch (out,in)
        b = jax.random.normal(kb, (out_f,), jnp.float32) * 0.05
        return w, b

    Wq, bq = lin(ks[0], num_heads * d, d)       # Attention.to_q : Linear(d, h*d)
    Wk, bk = lin(ks[1], num_heads * d, d)
    Wv, bv = lin(ks[2], num_heads * d, d)
    Wp, bp = lin(ks[3], dim, dim)               # Attention.proj : Linear(E, E)
    W1, b1 = lin(ks[4], hid, dim)               # Mlp.fc1
    W2, b2 = lin(ks[5], dim, hid)               # Mlp.fc2
    return dict(
        Wq=Wq, bq=bq, Wk=Wk, bk=bk, Wv=Wv, bv=bv, Wp=Wp, bp=bp,
        W1=W1, b1=b1, W2=W2, b2=b2,
        ln1w=jnp.ones((dim,), jnp.float32), ln1b=jnp.zeros((dim,), jnp.float32),
        ln2w=jnp.ones((dim,), jnp.float32), ln2b=jnp.zeros((dim,), jnp.float32),
        g1=layer_scale_init * jnp.ones((dim,), jnp.float32),
        g2=layer_scale_init * jnp.ones((dim,), jnp.float32),
    )


def _per_head_weights(W, num_heads, head_dim):
    # torch to_q weight W: (h*d, d); head i keeps output rows [i*d,(i+1)*d):
    #   q_i = x_head_i @ W[i*d:(i+1)*d, :].T + b[i*d:(i+1)*d]
    # -> stacked per-head (h, d, d) right-multiply matrices (no block-diag zeros).
    return jnp.stack(
        [W[i * head_dim:(i + 1) * head_dim, :].T for i in range(num_heads)],
        axis=0)


# -----------------------------------------------------------------------------
# Wrapper calling pallas_call
# -----------------------------------------------------------------------------
def block_forward(x, params, num_heads, uni_causal_mask=None, eps=1e-5,
                  batch_block=None):
    B, T, E = x.shape
    d = E // num_heads
    scale = d ** (-0.5)

    # Batch elements per grid step: aim for >= ~256 rows into the MXU, must
    # divide B exactly.
    if batch_block is None:
        batch_block = max(1, min(B, -(-256 // T)))
    while B % batch_block:
        batch_block -= 1
    Bblk = batch_block

    f32, bf16 = jnp.float32, jnp.bfloat16
    row = lambda v: v.reshape(1, -1).astype(f32)

    # per-head q/k/v weights; fold 1/sqrt(d) into the q path at trace time
    wq = (_per_head_weights(params["Wq"], num_heads, d) * scale).astype(bf16)
    wk = _per_head_weights(params["Wk"], num_heads, d).astype(bf16)
    wv = _per_head_weights(params["Wv"], num_heads, d).astype(bf16)

    args = [x.astype(f32)]
    has_mask = uni_causal_mask is not None
    if has_mask:
        args.append(jnp.broadcast_to(uni_causal_mask.astype(f32), (T, T)))
    args += [
        row(params["ln1w"]), row(params["ln1b"]),
        wq, row(params["bq"]) * scale,
        wk, row(params["bk"]),
        wv, row(params["bv"]),
        params["Wp"].T.astype(bf16), row(params["bp"]),
        row(params["ln2w"]), row(params["ln2b"]),
        params["W1"].T.astype(bf16), row(params["b1"]),
        params["W2"].T.astype(bf16), row(params["b2"]),
        row(params["g1"]), row(params["g2"]),
    ]

    in_specs = [pl.BlockSpec((Bblk, T, E), lambda b: (b, 0, 0))]
    for a in args[1:]:
        # Parameters / mask are grid-invariant: constant index_map, fetched once
        # and resident in VMEM across grid steps. (At production dims one would
        # additionally single-buffer these specs to halve their VMEM footprint.)
        in_specs.append(pl.BlockSpec(a.shape, lambda b, _nd=a.ndim: (0,) * _nd))

    kernel = functools.partial(
        _block_kernel, num_heads=num_heads, head_dim=d, eps=eps,
        has_mask=has_mask, bblk=Bblk, seq=T)

    return pl.pallas_call(
        kernel,
        out_shape=jax.ShapeDtypeStruct((B, T, E), f32),
        grid_spec=pltpu.PrefetchScalarGridSpec(
            num_scalar_prefetch=0,
            grid=(B // Bblk,),
            in_specs=in_specs,
            out_specs=pl.BlockSpec((Bblk, T, E), lambda b: (b, 0, 0)),
        ),
        compiler_params=pltpu.CompilerParams(
            dimension_semantics=("parallel",),        # batch axis is independent
            vmem_limit_bytes=64 * 1024 * 1024,
        ),
    )(*args)


# -----------------------------------------------------------------------------
# Pure-JAX reference that mirrors the PyTorch forward literally (for checking)
# -----------------------------------------------------------------------------
def reference_block(x, p, num_heads, uni_causal_mask=None, eps=1e-5):
    B, T, E = x.shape
    d = E // num_heads
    scale = d ** (-0.5)

    def ln(z, w, b):
        mu = z.mean(-1, keepdims=True)
        var = ((z - mu) ** 2).mean(-1, keepdims=True)
        return (z - mu) / jnp.sqrt(var + eps) * w + b

    def heads_proj(xh, W, b):
        # xh: (B,T,h,d); torch Linear(d, h*d) then get_head_dim selection.
        full = jnp.einsum("bthd,ed->bthe", xh, W) + b        # (B,T,h,E)
        outs = [full[:, :, i, i * d:(i + 1) * d] for i in range(num_heads)]
        return jnp.stack(outs, axis=1)                        # (B,h,T,d)

    xn = ln(x, p["ln1w"], p["ln1b"])
    xh = xn.reshape(B, T, num_heads, d)
    q = heads_proj(xh, p["Wq"], p["bq"]) * scale
    k = heads_proj(xh, p["Wk"], p["bk"])
    v = heads_proj(xh, p["Wv"], p["bv"])
    attn = jnp.einsum("bhtd,bhsd->bhts", q, k)
    if uni_causal_mask is not None:
        attn = attn + uni_causal_mask
    attn = jax.nn.softmax(attn, axis=-1)
    out = jnp.einsum("bhts,bhsd->bhtd", attn, v)
    out = jnp.transpose(out, (0, 2, 1, 3)).reshape(B, T, E)
    out = out @ p["Wp"].T + p["bp"]
    x1 = x + p["g1"] * out

    x2 = ln(x1, p["ln2w"], p["ln2b"])
    h1 = x2 @ p["W1"].T + p["b1"]
    h1 = 0.5 * h1 * (1.0 + jax.lax.erf(h1 / jnp.sqrt(2.0)))
    h2 = h1 @ p["W2"].T + p["b2"]
    return x1 + p["g2"] * h2


# -----------------------------------------------------------------------------
if __name__ == "__main__":
    B, T, E, NUM_HEADS = 2, 8, 32, 4        # head_dim = 8, mlp hidden = 128
    key = jax.random.PRNGKey(0)
    kx, kp = jax.random.split(key)
    x = jax.random.normal(kx, (B, T, E), jnp.float32)
    params = init_params(kp, E, NUM_HEADS)

    # --- no-mask path ---
    out = jax.block_until_ready(block_forward(x, params, num_heads=NUM_HEADS))
    ref = reference_block(x, params, num_heads=NUM_HEADS)
    assert out.shape == (B, T, E)
    err = float(jnp.max(jnp.abs(out - ref)))
    assert jnp.allclose(out, ref, rtol=2e-2, atol=2e-2), f"max abs err (no mask) = {err}"

    # --- causal-mask path ---
    mask = jnp.where(jnp.tril(jnp.ones((T, T), dtype=bool)), 0.0, -1e9).astype(jnp.float32)
    out_m = jax.block_until_ready(
        block_forward(x, params, num_heads=NUM_HEADS, uni_causal_mask=mask))
    ref_m = reference_block(x, params, num_heads=NUM_HEADS, uni_causal_mask=mask)
    err_m = float(jnp.max(jnp.abs(out_m - ref_m)))
    assert jnp.allclose(out_m, ref_m, rtol=2e-2, atol=2e-2), f"max abs err (mask) = {err_m}"

    print("KERNEL_OK")
</pallas_src>

<mosaic_0001>
module attributes {stable_mosaic.version = 11 : i64} {
  func.func @_block_kernel(%arg0: i32, %arg1: memref<2x8x32xf32, #tpu.memory_space<vmem>>, %arg2: memref<1x32xf32, #tpu.memory_space<vmem>>, %arg3: memref<1x32xf32, #tpu.memory_space<vmem>>, %arg4: memref<4x8x8xbf16, #tpu.memory_space<vmem>>, %arg5: memref<1x32xf32, #tpu.memory_space<vmem>>, %arg6: memref<4x8x8xbf16, #tpu.memory_space<vmem>>, %arg7: memref<1x32xf32, #tpu.memory_space<vmem>>, %arg8: memref<4x8x8xbf16, #tpu.memory_space<vmem>>, %arg9: memref<1x32xf32, #tpu.memory_space<vmem>>, %arg10: memref<32x32xbf16, #tpu.memory_space<vmem>>, %arg11: memref<1x32xf32, #tpu.memory_space<vmem>>, %arg12: memref<1x32xf32, #tpu.memory_space<vmem>>, %arg13: memref<1x32xf32, #tpu.memory_space<vmem>>, %arg14: memref<32x128xbf16, #tpu.memory_space<vmem>>, %arg15: memref<1x128xf32, #tpu.memory_space<vmem>>, %arg16: memref<128x32xbf16, #tpu.memory_space<vmem>>, %arg17: memref<1x32xf32, #tpu.memory_space<vmem>>, %arg18: memref<1x32xf32, #tpu.memory_space<vmem>>, %arg19: memref<1x32xf32, #tpu.memory_space<vmem>>, %arg20: memref<2x8x32xf32, #tpu.memory_space<vmem>>) attributes {dimension_semantics = [#tpu.dimension_semantics<parallel>], iteration_bounds = array<i64: 1>, scalar_prefetch = 0 : i64, scratch_operands = 0 : i64, tpu.core_type = #tpu.core_type<tc>, window_params = [{transform_indices = @transform_0, window_bounds = array<i64: 2, 8, 32>}, {pipeline_mode = #tpu.pipeline_mode<synchronous>, transform_indices = @transform_1, window_bounds = array<i64: 1, 32>}, {pipeline_mode = #tpu.pipeline_mode<synchronous>, transform_indices = @transform_2, window_bounds = array<i64: 1, 32>}, {pipeline_mode = #tpu.pipeline_mode<synchronous>, transform_indices = @transform_3, window_bounds = array<i64: 4, 8, 8>}, {pipeline_mode = #tpu.pipeline_mode<synchronous>, transform_indices = @transform_4, window_bounds = array<i64: 1, 32>}, {pipeline_mode = #tpu.pipeline_mode<synchronous>, transform_indices = @transform_5, window_bounds = array<i64: 4, 8, 8>}, {pipeline_mode = #tpu.pipeline_mode<synchronous>, transform_indices = @transform_6, window_bounds = array<i64: 1, 32>}, {pipeline_mode = #tpu.pipeline_mode<synchronous>, transform_indices = @transform_7, window_bounds = array<i64: 4, 8, 8>}, {pipeline_mode = #tpu.pipeline_mode<synchronous>, transform_indices = @transform_8, window_bounds = array<i64: 1, 32>}, {pipeline_mode = #tpu.pipeline_mode<synchronous>, transform_indices = @transform_9, window_bounds = array<i64: 32, 32>}, {pipeline_mode = #tpu.pipeline_mode<synchronous>, transform_indices = @transform_10, window_bounds = array<i64: 1, 32>}, {pipeline_mode = #tpu.pipeline_mode<synchronous>, transform_indices = @transform_11, window_bounds = array<i64: 1, 32>}, {pipeline_mode = #tpu.pipeline_mode<synchronous>, transform_indices = @transform_12, window_bounds = array<i64: 1, 32>}, {pipeline_mode = #tpu.pipeline_mode<synchronous>, transform_indices = @transform_13, window_bounds = array<i64: 32, 128>}, {pipeline_mode = #tpu.pipeline_mode<synchronous>, transform_indices = @transform_14, window_bounds = array<i64: 1, 128>}, {pipeline_mode = #tpu.pipeline_mode<synchronous>, transform_indices = @transform_15, window_bounds = array<i64: 128, 32>}, {pipeline_mode = #tpu.pipeline_mode<synchronous>, transform_indices = @transform_16, window_bounds = array<i64: 1, 32>}, {pipeline_mode = #tpu.pipeline_mode<synchronous>, transform_indices = @transform_17, window_bounds = array<i64: 1, 32>}, {pipeline_mode = #tpu.pipeline_mode<synchronous>, transform_indices = @transform_18, window_bounds = array<i64: 1, 32>}, {transform_indices = @transform_19, window_bounds = array<i64: 2, 8, 32>}]} {
    %c0 = arith.constant 0 : index
    %c0_0 = arith.constant 0 : index
    %c0_1 = arith.constant 0 : index
    %0 = vector.load %arg1[%c0, %c0_0, %c0_1] : memref<2x8x32xf32, #tpu.memory_space<vmem>>, vector<2x8x32xf32>
    %1 = vector.shape_cast %0 : vector<2x8x32xf32> to vector<16x32xf32>
    %cst = arith.constant dense<0.000000e+00> : vector<16xf32>
    %2 = vector.multi_reduction <add>, %1, %cst [1] : vector<16x32xf32> to vector<16xf32>
    %3 = vector.shape_cast %2 : vector<16xf32> to vector<16x1xf32>
    %cst_2 = arith.constant 3.200000e+01 : f32
    %4 = vector.broadcast %cst_2 : f32 to vector<16x1xf32>
    %5 = arith.divf %3, %4 : vector<16x1xf32>
    %6 = vector.broadcast %5 : vector<16x1xf32> to vector<16x32xf32>
    %7 = arith.subf %1, %6 : vector<16x32xf32>
    %8 = arith.mulf %7, %7 : vector<16x32xf32>
    %cst_3 = arith.constant dense<0.000000e+00> : vector<16xf32>
    %9 = vector.multi_reduction <add>, %8, %cst_3 [1] : vector<16x32xf32> to vector<16xf32>
    %10 = vector.shape_cast %9 : vector<16xf32> to vector<16x1xf32>
    %cst_4 = arith.constant 3.200000e+01 : f32
    %11 = vector.broadcast %cst_4 : f32 to vector<16x1xf32>
    %12 = arith.divf %10, %11 : vector<16x1xf32>
    %13 = vector.broadcast %5 : vector<16x1xf32> to vector<16x32xf32>
    %14 = arith.subf %1, %13 : vector<16x32xf32>
    %cst_5 = arith.constant 9.99999974E-6 : f32
    %15 = vector.broadcast %cst_5 : f32 to vector<16x1xf32>
    %16 = arith.addf %12, %15 : vector<16x1xf32>
    %17 = math.rsqrt %16 : vector<16x1xf32>
    %18 = vector.broadcast %17 : vector<16x1xf32> to vector<16x32xf32>
    %19 = arith.mulf %14, %18 : vector<16x32xf32>
    %c0_6 = arith.constant 0 : index
    %c0_7 = arith.constant 0 : index
    %20 = vector.load %arg2[%c0_6, %c0_7] : memref<1x32xf32, #tpu.memory_space<vmem>>, vector<1x32xf32>
    %21 = vector.broadcast %20 : vector<1x32xf32> to vector<16x32xf32>
    %22 = arith.mulf %19, %21 : vector<16x32xf32>
    %c0_8 = arith.constant 0 : index
    %c0_9 = arith.constant 0 : index
    %23 = vector.load %arg3[%c0_8, %c0_9] : memref<1x32xf32, #tpu.memory_space<vmem>>, vector<1x32xf32>
    %24 = vector.broadcast %23 : vector<1x32xf32> to vector<16x32xf32>
    %25 = arith.addf %22, %24 : vector<16x32xf32>
    %26 = arith.truncf %25 : vector<16x32xf32> to vector<16x32xbf16>
    %cst_10 = arith.constant 0.000000e+00 : f32
    %27 = vector.broadcast %cst_10 : f32 to vector<16x32xf32>
    %28 = vector.extract_strided_slice %26 {offsets = [0, 0], sizes = [16, 8], strides = [1, 1]} : vector<16x32xbf16> to vector<16x8xbf16>
    %c0_11 = arith.constant 0 : index
    %c0_12 = arith.constant 0 : index
    %c0_13 = arith.constant 0 : index
    %29 = vector.load %arg4[%c0_11, %c0_12, %c0_13] : memref<4x8x8xbf16, #tpu.memory_space<vmem>>, vector<1x8x8xbf16>
    %30 = vector.shape_cast %29 : vector<1x8x8xbf16> to vector<8x8xbf16>
    %cst_14 = arith.constant dense<0.000000e+00> : vector<16x8xf32>
    %31 = tpu.matmul %28, %30, %cst_14 {dimension_numbers = #tpu.dot_dimension_numbers<[1], [0], [0], [1], [0, 0, 1, 1], [], []>} : vector<16x8xbf16>, vector<8x8xbf16>, vector<16x8xf32> -> vector<16x8xf32>
    %c0_15 = arith.constant 0 : index
    %c0_16 = arith.constant 0 : index
    %32 = vector.load %arg5[%c0_15, %c0_16] : memref<1x32xf32, #tpu.memory_space<vmem>>, vector<1x8xf32>
    %33 = vector.broadcast %32 : vector<1x8xf32> to vector<16x8xf32>
    %34 = arith.addf %31, %33 : vector<16x8xf32>
    %c0_17 = arith.constant 0 : index
    %c0_18 = arith.constant 0 : index
    %c0_19 = arith.constant 0 : index
    %35 = vector.load %arg6[%c0_17, %c0_18, %c0_19] : memref<4x8x8xbf16, #tpu.memory_space<vmem>>, vector<1x8x8xbf16>
    %36 = vector.shape_cast %35 : vector<1x8x8xbf16> to vector<8x8xbf16>
    %cst_20 = arith.constant dense<0.000000e+00> : vector<16x8xf32>
    %37 = tpu.matmul %28, %36, %cst_20 {dimension_numbers = #tpu.dot_dimension_numbers<[1], [0], [0], [1], [0, 0, 1, 1], [], []>} : vector<16x8xbf16>, vector<8x8xbf16>, vector<16x8xf32> -> vector<16x8xf32>
    %c0_21 = arith.constant 0 : index
    %c0_22 = arith.constant 0 : index
    %38 = vector.load %arg7[%c0_21, %c0_22] : memref<1x32xf32, #tpu.memory_space<vmem>>, vector<1x8xf32>
    %39 = vector.broadcast %38 : vector<1x8xf32> to vector<16x8xf32>
    %40 = arith.addf %37, %39 : vector<16x8xf32>
    %c0_23 = arith.constant 0 : index
    %c0_24 = arith.constant 0 : index
    %c0_25 = arith.constant 0 : index
    %41 = vector.load %arg8[%c0_23, %c0_24, %c0_25] : memref<4x8x8xbf16, #tpu.memory_space<vmem>>, vector<1x8x8xbf16>
    %42 = vector.shape_cast %41 : vector<1x8x8xbf16> to vector<8x8xbf16>
    %cst_26 = arith.constant dense<0.000000e+00> : vector<16x8xf32>
    %43 = tpu.matmul %28, %42, %cst_26 {dimension_numbers = #tpu.dot_dimension_numbers<[1], [0], [0], [1], [0, 0, 1, 1], [], []>} : vector<16x8xbf16>, vector<8x8xbf16>, vector<16x8xf32> -> vector<16x8xf32>
    %c0_27 = arith.constant 0 : index
    %c0_28 = arith.constant 0 : index
    %44 = vector.load %arg9[%c0_27, %c0_28] : memref<1x32xf32, #tpu.memory_space<vmem>>, vector<1x8xf32>
    %45 = vector.broadcast %44 : vector<1x8xf32> to vector<16x8xf32>
    %46 = arith.addf %43, %45 : vector<16x8xf32>
    %47 = vector.shape_cast %34 : vector<16x8xf32> to vector<2x8x8xf32>
    %48 = arith.truncf %47 : vector<2x8x8xf32> to vector<2x8x8xbf16>
    %49 = vector.shape_cast %40 : vector<16x8xf32> to vector<2x8x8xf32>
    %50 = arith.truncf %49 : vector<2x8x8xf32> to vector<2x8x8xbf16>
    %51 = vector.shape_cast %46 : vector<16x8xf32> to vector<2x8x8xf32>
    %52 = arith.truncf %51 : vector<2x8x8xf32> to vector<2x8x8xbf16>
    "tpu.trace_start"() <{level = 10 : i32, message = "bqd,bkd->bqk"}> : () -> ()
    %cst_29 = arith.constant dense<0.000000e+00> : vector<2x8x8xf32>
    %53 = tpu.matmul %48, %50, %cst_29 {dimension_numbers = #tpu.dot_dimension_numbers<[2], [2], [1], [1], [0, 0, 0, 1, 1, 1], [0], [0]>} : vector<2x8x8xbf16>, vector<2x8x8xbf16>, vector<2x8x8xf32> -> vector<2x8x8xf32>
    "tpu.trace_stop"() : () -> ()
    %cst_30 = arith.constant dense<0xFF800000> : vector<2x8xf32>
    %54 = vector.multi_reduction <maximumf>, %53, %cst_30 [2] : vector<2x8x8xf32> to vector<2x8xf32>
    %55 = vector.shape_cast %54 : vector<2x8xf32> to vector<2x8x1xf32>
    %56 = vector.broadcast %55 : vector<2x8x1xf32> to vector<2x8x8xf32>
    %57 = arith.subf %53, %56 : vector<2x8x8xf32>
    %58 = math.exp %57 : vector<2x8x8xf32>
    %cst_31 = arith.constant dense<0.000000e+00> : vector<2x8xf32>
    %59 = vector.multi_reduction <add>, %58, %cst_31 [2] : vector<2x8x8xf32> to vector<2x8xf32>
    %60 = vector.shape_cast %59 : vector<2x8xf32> to vector<2x8x1xf32>
    %61 = tpu.reciprocal %60 {approx = true} : vector<2x8x1xf32> -> vector<2x8x1xf32>
    %62 = vector.broadcast %61 : vector<2x8x1xf32> to vector<2x8x8xf32>
    %63 = arith.mulf %58, %62 : vector<2x8x8xf32>
    %64 = arith.truncf %63 : vector<2x8x8xf32> to vector<2x8x8xbf16>
    "tpu.trace_start"() <{level = 10 : i32, message = "bqk,bkd->bqd"}> : () -> ()
    %cst_32 = arith.constant dense<0.000000e+00> : vector<2x8x8xf32>
    %65 = tpu.matmul %64, %52, %cst_32 {dimension_numbers = #tpu.dot_dimension_numbers<[2], [1], [1], [2], [0, 0, 0, 1, 1, 2], [0], [0]>} : vector<2x8x8xbf16>, vector<2x8x8xbf16>, vector<2x8x8xf32> -> vector<2x8x8xf32>
    "tpu.trace_stop"() : () -> ()
    %66 = vector.shape_cast %65 : vector<2x8x8xf32> to vector<16x8xf32>
    %67 = arith.truncf %66 : vector<16x8xf32> to vector<16x8xbf16>
    %c0_33 = arith.constant 0 : index
    %c0_34 = arith.constant 0 : index
    %68 = vector.load %arg10[%c0_33, %c0_34] : memref<32x32xbf16, #tpu.memory_space<vmem>>, vector<8x32xbf16>
    %cst_35 = arith.constant dense<0.000000e+00> : vector<16x32xf32>
    %69 = tpu.matmul %67, %68, %cst_35 {dimension_numbers = #tpu.dot_dimension_numbers<[1], [0], [0], [1], [0, 0, 1, 1], [], []>} : vector<16x8xbf16>, vector<8x32xbf16>, vector<16x32xf32> -> vector<16x32xf32>
    %70 = arith.addf %27, %69 : vector<16x32xf32>
    %71 = vector.extract_strided_slice %26 {offsets = [0, 8], sizes = [16, 8], strides = [1, 1]} : vector<16x32xbf16> to vector<16x8xbf16>
    %c1 = arith.constant 1 : index
    %c0_36 = arith.constant 0 : index
    %c0_37 = arith.constant 0 : index
    %72 = vector.load %arg4[%c1, %c0_36, %c0_37] : memref<4x8x8xbf16, #tpu.memory_space<vmem>>, vector<1x8x8xbf16>
    %73 = vector.shape_cast %72 : vector<1x8x8xbf16> to vector<8x8xbf16>
    %cst_38 = arith.constant dense<0.000000e+00> : vector<16x8xf32>
    %74 = tpu.matmul %71, %73, %cst_38 {dimension_numbers = #tpu.dot_dimension_numbers<[1], [0], [0], [1], [0, 0, 1, 1], [], []>} : vector<16x8xbf16>, vector<8x8xbf16>, vector<16x8xf32> -> vector<16x8xf32>
    %c0_39 = arith.constant 0 : index
    %c8 = arith.constant 8 : index
    %75 = vector.load %arg5[%c0_39, %c8] : memref<1x32xf32, #tpu.memory_space<vmem>>, vector<1x8xf32>
    %76 = vector.broadcast %75 : vector<1x8xf32> to vector<16x8xf32>
    %77 = arith.addf %74, %76 : vector<16x8xf32>
    %c1_40 = arith.constant 1 : index
    %c0_41 = arith.constant 0 : index
    %c0_42 = arith.constant 0 : index
    %78 = vector.load %arg6[%c1_40, %c0_41, %c0_42] : memref<4x8x8xbf16, #tpu.memory_space<vmem>>, vector<1x8x8xbf16>
    %79 = vector.shape_cast %78 : vector<1x8x8xbf16> to vector<8x8xbf16>
    %cst_43 = arith.constant dense<0.000000e+00> : vector<16x8xf32>
    %80 = tpu.matmul %71, %79, %cst_43 {dimension_numbers = #tpu.dot_dimension_numbers<[1], [0], [0], [1], [0, 0, 1, 1], [], []>} : vector<16x8xbf16>, vector<8x8xbf16>, vector<16x8xf32> -> vector<16x8xf32>
    %c0_44 = arith.constant 0 : index
    %c8_45 = arith.constant 8 : index
    %81 = vector.load %arg7[%c0_44, %c8_45] : memref<1x32xf32, #tpu.memory_space<vmem>>, vector<1x8xf32>
    %82 = vector.broadcast %81 : vector<1x8xf32> to vector<16x8xf32>
    %83 = arith.addf %80, %82 : vector<16x8xf32>
    %c1_46 = arith.constant 1 : index
    %c0_47 = arith.constant 0 : index
    %c0_48 = arith.constant 0 : index
    %84 = vector.load %arg8[%c1_46, %c0_47, %c0_48] : memref<4x8x8xbf16, #tpu.memory_space<vmem>>, vector<1x8x8xbf16>
    %85 = vector.shape_cast %84 : vector<1x8x8xbf16> to vector<8x8xbf16>
    %cst_49 = arith.constant dense<0.000000e+00> : vector<16x8xf32>
    %86 = tpu.matmul %71, %85, %cst_49 {dimension_numbers = #tpu.dot_dimension_numbers<[1], [0], [0], [1], [0, 0, 1, 1], [], []>} : vector<16x8xbf16>, vector<8x8xbf16>, vector<16x8xf32> -> vector<16x8xf32>
    %c0_50 = arith.constant 0 : index
    %c8_51 = arith.constant 8 : index
    %87 = vector.load %arg9[%c0_50, %c8_51] : memref<1x32xf32, #tpu.memory_space<vmem>>, vector<1x8xf32>
    %88 = vector.broadcast %87 : vector<1x8xf32> to vector<16x8xf32>
    %89 = arith.addf %86, %88 : vector<16x8xf32>
    %90 = vector.shape_cast %77 : vector<16x8xf32> to vector<2x8x8xf32>
    %91 = arith.truncf %90 : vector<2x8x8xf32> to vector<2x8x8xbf16>
    %92 = vector.shape_cast %83 : vector<16x8xf32> to vector<2x8x8xf32>
    %93 = arith.truncf %92 : vector<2x8x8xf32> to vector<2x8x8xbf16>
    %94 = vector.shape_cast %89 : vector<16x8xf32> to vector<2x8x8xf32>
    %95 = arith.truncf %94 : vector<2x8x8xf32> to vector<2x8x8xbf16>
    "tpu.trace_start"() <{level = 10 : i32, message = "bqd,bkd->bqk"}> : () -> ()
    %cst_52 = arith.constant dense<0.000000e+00> : vector<2x8x8xf32>
    %96 = tpu.matmul %91, %93, %cst_52 {dimension_numbers = #tpu.dot_dimension_numbers<[2], [2], [1], [1], [0, 0, 0, 1, 1, 1], [0], [0]>} : vector<2x8x8xbf16>, vector<2x8x8xbf16>, vector<2x8x8xf32> -> vector<2x8x8xf32>
    "tpu.trace_stop"() : () -> ()
    %cst_53 = arith.constant dense<0xFF800000> : vector<2x8xf32>
    %97 = vector.multi_reduction <maximumf>, %96, %cst_53 [2] : vector<2x8x8xf32> to vector<2x8xf32>
    %98 = vector.shape_cast %97 : vector<2x8xf32> to vector<2x8x1xf32>
    %99 = vector.broadcast %98 : vector<2x8x1xf32> to vector<2x8x8xf32>
    %100 = arith.subf %96, %99 : vector<2x8x8xf32>
    %101 = math.exp %100 : vector<2x8x8xf32>
    %cst_54 = arith.constant dense<0.000000e+00> : vector<2x8xf32>
    %102 = vector.multi_reduction <add>, %101, %cst_54 [2] : vector<2x8x8xf32> to vector<2x8xf32>
    %103 = vector.shape_cast %102 : vector<2x8xf32> to vector<2x8x1xf32>
    %104 = tpu.reciprocal %103 {approx = true} : vector<2x8x1xf32> -> vector<2x8x1xf32>
    %105 = vector.broadcast %104 : vector<2x8x1xf32> to vector<2x8x8xf32>
    %106 = arith.mulf %101, %105 : vector<2x8x8xf32>
    %107 = arith.truncf %106 : vector<2x8x8xf32> to vector<2x8x8xbf16>
    "tpu.trace_start"() <{level = 10 : i32, message = "bqk,bkd->bqd"}> : () -> ()
    %cst_55 = arith.constant dense<0.000000e+00> : vector<2x8x8xf32>
    %108 = tpu.matmul %107, %95, %cst_55 {dimension_numbers = #tpu.dot_dimension_numbers<[2], [1], [1], [2], [0, 0, 0, 1, 1, 2], [0], [0]>} : vector<2x8x8xbf16>, vector<2x8x8xbf16>, vector<2x8x8xf32> -> vector<2x8x8xf32>
    "tpu.trace_stop"() : () -> ()
    %109 = vector.shape_cast %108 : vector<2x8x8xf32> to vector<16x8xf32>
    %110 = arith.truncf %109 : vector<16x8xf32> to vector<16x8xbf16>
    %c8_56 = arith.constant 8 : index
    %c0_57 = arith.constant 0 : index
    %111 = vector.load %arg10[%c8_56, %c0_57] : memref<32x32xbf16, #tpu.memory_space<vmem>>, vector<8x32xbf16>
    %cst_58 = arith.constant dense<0.000000e+00> : vector<16x32xf32>
    %112 = tpu.matmul %110, %111, %cst_58 {dimension_numbers = #tpu.dot_dimension_numbers<[1], [0], [0], [1], [0, 0, 1, 1], [], []>} : vector<16x8xbf16>, vector<8x32xbf16>, vector<16x32xf32> -> vector<16x32xf32>
    %113 = arith.addf %70, %112 : vector<16x32xf32>
    %114 = vector.extract_strided_slice %26 {offsets = [0, 16], sizes = [16, 8], strides = [1, 1]} : vector<16x32xbf16> to vector<16x8xbf16>
    %c2 = arith.constant 2 : index
    %c0_59 = arith.constant 0 : index
    %c0_60 = arith.constant 0 : index
    %115 = vector.load %arg4[%c2, %c0_59, %c0_60] : memref<4x8x8xbf16, #tpu.memory_space<vmem>>, vector<1x8x8xbf16>
    %116 = vector.shape_cast %115 : vector<1x8x8xbf16> to vector<8x8xbf16>
    %cst_61 = arith.constant dense<0.000000e+00> : vector<16x8xf32>
    %117 = tpu.matmul %114, %116, %cst_61 {dimension_numbers = #tpu.dot_dimension_numbers<[1], [0], [0], [1], [0, 0, 1, 1], [], []>} : vector<16x8xbf16>, vector<8x8xbf16>, vector<16x8xf32> -> vector<16x8xf32>
    %c0_62 = arith.constant 0 : index
    %c16 = arith.constant 16 : index
    %118 = vector.load %arg5[%c0_62, %c16] : memref<1x32xf32, #tpu.memory_space<vmem>>, vector<1x8xf32>
    %119 = vector.broadcast %118 : vector<1x8xf32> to vector<16x8xf32>
    %120 = arith.addf %117, %119 : vector<16x8xf32>
    %c2_63 = arith.constant 2 : index
    %c0_64 = arith.constant 0 : index
    %c0_65 = arith.constant 0 : index
    %121 = vector.load %arg6[%c2_63, %c0_64, %c0_65] : memref<4x8x8xbf16, #tpu.memory_space<vmem>>, vector<1x8x8xbf16>
    %122 = vector.shape_cast %121 : vector<1x8x8xbf16> to vector<8x8xbf16>
    %cst_66 = arith.constant dense<0.000000e+00> : vector<16x8xf32>
    %123 = tpu.matmul %114, %122, %cst_66 {dimension_numbers = #tpu.dot_dimension_numbers<[1], [0], [0], [1], [0, 0, 1, 1], [], []>} : vector<16x8xbf16>, vector<8x8xbf16>, vector<16x8xf32> -> vector<16x8xf32>
    %c0_67 = arith.constant 0 : index
    %c16_68 = arith.constant 16 : index
    %124 = vector.load %arg7[%c0_67, %c16_68] : memref<1x32xf32, #tpu.memory_space<vmem>>, vector<1x8xf32>
    %125 = vector.broadcast %124 : vector<1x8xf32> to vector<16x8xf32>
    %126 = arith.addf %123, %125 : vector<16x8xf32>
    %c2_69 = arith.constant 2 : index
    %c0_70 = arith.constant 0 : index
    %c0_71 = arith.constant 0 : index
    %127 = vector.load %arg8[%c2_69, %c0_70, %c0_71] : memref<4x8x8xbf16, #tpu.memory_space<vmem>>, vector<1x8x8xbf16>
    %128 = vector.shape_cast %127 : vector<1x8x8xbf16> to vector<8x8xbf16>
    %cst_72 = arith.constant dense<0.000000e+00> : vector<16x8xf32>
    %129 = tpu.matmul %114, %128, %cst_72 {dimension_numbers = #tpu.dot_dimension_numbers<[1], [0], [0], [1], [0, 0, 1, 1], [], []>} : vector<16x8xbf16>, vector<8x8xbf16>, vector<16x8xf32> -> vector<16x8xf32>
    %c0_73 = arith.constant 0 : index
    %c16_74 = arith.constant 16 : index
    %130 = vector.load %arg9[%c0_73, %c16_74] : memref<1x32xf32, #tpu.memory_space<vmem>>, vector<1x8xf32>
    %131 = vector.broadcast %130 : vector<1x8xf32> to vector<16x8xf32>
    %132 = arith.addf %129, %131 : vector<16x8xf32>
    %133 = vector.shape_cast %120 : vector<16x8xf32> to vector<2x8x8xf32>
    %134 = arith.truncf %133 : vector<2x8x8xf32> to vector<2x8x8xbf16>
    %135 = vector.shape_cast %126 : vector<16x8xf32> to vector<2x8x8xf32>
    %136 = arith.truncf %135 : vector<2x8x8xf32> to vector<2x8x8xbf16>
    %137 = vector.shape_cast %132 : vector<16x8xf32> to vector<2x8x8xf32>
    %138 = arith.truncf %137 : vector<2x8x8xf32> to vector<2x8x8xbf16>
    "tpu.trace_start"() <{level = 10 : i32, message = "bqd,bkd->bqk"}> : () -> ()
    %cst_75 = arith.constant dense<0.000000e+00> : vector<2x8x8xf32>
    %139 = tpu.matmul %134, %136, %cst_75 {dimension_numbers = #tpu.dot_dimension_numbers<[2], [2], [1], [1], [0, 0, 0, 1, 1, 1], [0], [0]>} : vector<2x8x8xbf16>, vector<2x8x8xbf16>, vector<2x8x8xf32> -> vector<2x8x8xf32>
    "tpu.trace_stop"() : () -> ()
    %cst_76 = arith.constant dense<0xFF800000> : vector<2x8xf32>
    %140 = vector.multi_reduction <maximumf>, %139, %cst_76 [2] : vector<2x8x8xf32> to vector<2x8xf32>
    %141 = vector.shape_cast %140 : vector<2x8xf32> to vector<2x8x1xf32>
    %142 = vector.broadcast %141 : vector<2x8x1xf32> to vector<2x8x8xf32>
    %143 = arith.subf %139, %142 : vector<2x8x8xf32>
    %144 = math.exp %143 : vector<2x8x8xf32>
    %cst_77 = arith.constant dense<0.000000e+00> : vector<2x8xf32>
    %145 = vector.multi_reduction <add>, %144, %cst_77 [2] : vector<2x8x8xf32> to vector<2x8xf32>
    %146 = vector.shape_cast %145 : vector<2x8xf32> to vector<2x8x1xf32>
    %147 = tpu.reciprocal %146 {approx = true} : vector<2x8x1xf32> -> vector<2x8x1xf32>
    %148 = vector.broadcast %147 : vector<2x8x1xf32> to vector<2x8x8xf32>
    %149 = arith.mulf %144, %148 : vector<2x8x8xf32>
    %150 = arith.truncf %149 : vector<2x8x8xf32> to vector<2x8x8xbf16>
    "tpu.trace_start"() <{level = 10 : i32, message = "bqk,bkd->bqd"}> : () -> ()
    %cst_78 = arith.constant dense<0.000000e+00> : vector<2x8x8xf32>
    %151 = tpu.matmul %150, %138, %cst_78 {dimension_numbers = #tpu.dot_dimension_numbers<[2], [1], [1], [2], [0, 0, 0, 1, 1, 2], [0], [0]>} : vector<2x8x8xbf16>, vector<2x8x8xbf16>, vector<2x8x8xf32> -> vector<2x8x8xf32>
    "tpu.trace_stop"() : () -> ()
    %152 = vector.shape_cast %151 : vector<2x8x8xf32> to vector<16x8xf32>
    %153 = arith.truncf %152 : vector<16x8xf32> to vector<16x8xbf16>
    %c16_79 = arith.constant 16 : index
    %c0_80 = arith.constant 0 : index
    %154 = vector.load %arg10[%c16_79, %c0_80] : memref<32x32xbf16, #tpu.memory_space<vmem>>, vector<8x32xbf16>
    %cst_81 = arith.constant dense<0.000000e+00> : vector<16x32xf32>
    %155 = tpu.matmul %153, %154, %cst_81 {dimension_numbers = #tpu.dot_dimension_numbers<[1], [0], [0], [1], [0, 0, 1, 1], [], []>} : vector<16x8xbf16>, vector<8x32xbf16>, vector<16x32xf32> -> vector<16x32xf32>
    %156 = arith.addf %113, %155 : vector<16x32xf32>
    %157 = vector.extract_strided_slice %26 {offsets = [0, 24], sizes = [16, 8], strides = [1, 1]} : vector<16x32xbf16> to vector<16x8xbf16>
    %c3 = arith.constant 3 : index
    %c0_82 = arith.constant 0 : index
    %c0_83 = arith.constant 0 : index
    %158 = vector.load %arg4[%c3, %c0_82, %c0_83] : memref<4x8x8xbf16, #tpu.memory_space<vmem>>, vector<1x8x8xbf16>
    %159 = vector.shape_cast %158 : vector<1x8x8xbf16> to vector<8x8xbf16>
    %cst_84 = arith.constant dense<0.000000e+00> : vector<16x8xf32>
    %160 = tpu.matmul %157, %159, %cst_84 {dimension_numbers = #tpu.dot_dimension_numbers<[1], [0], [0], [1], [0, 0, 1, 1], [], []>} : vector<16x8xbf16>, vector<8x8xbf16>, vector<16x8xf32> -> vector<16x8xf32>
    %c0_85 = arith.constant 0 : index
    %c24 = arith.constant 24 : index
    %161 = vector.load %arg5[%c0_85, %c24] : memref<1x32xf32, #tpu.memory_space<vmem>>, vector<1x8xf32>
    %162 = vector.broadcast %161 : vector<1x8xf32> to vector<16x8xf32>
    %163 = arith.addf %160, %162 : vector<16x8xf32>
    %c3_86 = arith.constant 3 : index
    %c0_87 = arith.constant 0 : index
    %c0_88 = arith.constant 0 : index
    %164 = vector.load %arg6[%c3_86, %c0_87, %c0_88] : memref<4x8x8xbf16, #tpu.memory_space<vmem>>, vector<1x8x8xbf16>
    %165 = vector.shape_cast %164 : vector<1x8x8xbf16> to vector<8x8xbf16>
    %cst_89 = arith.constant dense<0.000000e+00> : vector<16x8xf32>
    %166 = tpu.matmul %157, %165, %cst_89 {dimension_numbers = #tpu.dot_dimension_numbers<[1], [0], [0], [1], [0, 0, 1, 1], [], []>} : vector<16x8xbf16>, vector<8x8xbf16>, vector<16x8xf32> -> vector<16x8xf32>
    %c0_90 = arith.constant 0 : index
    %c24_91 = arith.constant 24 : index
    %167 = vector.load %arg7[%c0_90, %c24_91] : memref<1x32xf32, #tpu.memory_space<vmem>>, vector<1x8xf32>
    %168 = vector.broadcast %167 : vector<1x8xf32> to vector<16x8xf32>
    %169 = arith.addf %166, %168 : vector<16x8xf32>
    %c3_92 = arith.constant 3 : index
    %c0_93 = arith.constant 0 : index
    %c0_94 = arith.constant 0 : index
    %170 = vector.load %arg8[%c3_92, %c0_93, %c0_94] : memref<4x8x8xbf16, #tpu.memory_space<vmem>>, vector<1x8x8xbf16>
    %171 = vector.shape_cast %170 : vector<1x8x8xbf16> to vector<8x8xbf16>
    %cst_95 = arith.constant dense<0.000000e+00> : vector<16x8xf32>
    %172 = tpu.matmul %157, %171, %cst_95 {dimension_numbers = #tpu.dot_dimension_numbers<[1], [0], [0], [1], [0, 0, 1, 1], [], []>} : vector<16x8xbf16>, vector<8x8xbf16>, vector<16x8xf32> -> vector<16x8xf32>
    %c0_96 = arith.constant 0 : index
    %c24_97 = arith.constant 24 : index
    %173 = vector.load %arg9[%c0_96, %c24_97] : memref<1x32xf32, #tpu.memory_space<vmem>>, vector<1x8xf32>
    %174 = vector.broadcast %173 : vector<1x8xf32> to vector<16x8xf32>
    %175 = arith.addf %172, %174 : vector<16x8xf32>
    %176 = vector.shape_cast %163 : vector<16x8xf32> to vector<2x8x8xf32>
    %177 = arith.truncf %176 : vector<2x8x8xf32> to vector<2x8x8xbf16>
    %178 = vector.shape_cast %169 : vector<16x8xf32> to vector<2x8x8xf32>
    %179 = arith.truncf %178 : vector<2x8x8xf32> to vector<2x8x8xbf16>
    %180 = vector.shape_cast %175 : vector<16x8xf32> to vector<2x8x8xf32>
    %181 = arith.truncf %180 : vector<2x8x8xf32> to vector<2x8x8xbf16>
    "tpu.trace_start"() <{level = 10 : i32, message = "bqd,bkd->bqk"}> : () -> ()
    %cst_98 = arith.constant dense<0.000000e+00> : vector<2x8x8xf32>
    %182 = tpu.matmul %177, %179, %cst_98 {dimension_numbers = #tpu.dot_dimension_numbers<[2], [2], [1], [1], [0, 0, 0, 1, 1, 1], [0], [0]>} : vector<2x8x8xbf16>, vector<2x8x8xbf16>, vector<2x8x8xf32> -> vector<2x8x8xf32>
    "tpu.trace_stop"() : () -> ()
    %cst_99 = arith.constant dense<0xFF800000> : vector<2x8xf32>
    %183 = vector.multi_reduction <maximumf>, %182, %cst_99 [2] : vector<2x8x8xf32> to vector<2x8xf32>
    %184 = vector.shape_cast %183 : vector<2x8xf32> to vector<2x8x1xf32>
    %185 = vector.broadcast %184 : vector<2x8x1xf32> to vector<2x8x8xf32>
    %186 = arith.subf %182, %185 : vector<2x8x8xf32>
    %187 = math.exp %186 : vector<2x8x8xf32>
    %cst_100 = arith.constant dense<0.000000e+00> : vector<2x8xf32>
    %188 = vector.multi_reduction <add>, %187, %cst_100 [2] : vector<2x8x8xf32> to vector<2x8xf32>
    %189 = vector.shape_cast %188 : vector<2x8xf32> to vector<2x8x1xf32>
    %190 = tpu.reciprocal %189 {approx = true} : vector<2x8x1xf32> -> vector<2x8x1xf32>
    %191 = vector.broadcast %190 : vector<2x8x1xf32> to vector<2x8x8xf32>
    %192 = arith.mulf %187, %191 : vector<2x8x8xf32>
    %193 = arith.truncf %192 : vector<2x8x8xf32> to vector<2x8x8xbf16>
    "tpu.trace_start"() <{level = 10 : i32, message = "bqk,bkd->bqd"}> : () -> ()
    %cst_101 = arith.constant dense<0.000000e+00> : vector<2x8x8xf32>
    %194 = tpu.matmul %193, %181, %cst_101 {dimension_numbers = #tpu.dot_dimension_numbers<[2], [1], [1], [2], [0, 0, 0, 1, 1, 2], [0], [0]>} : vector<2x8x8xbf16>, vector<2x8x8xbf16>, vector<2x8x8xf32> -> vector<2x8x8xf32>
    "tpu.trace_stop"() : () -> ()
    %195 = vector.shape_cast %194 : vector<2x8x8xf32> to vector<16x8xf32>
    %196 = arith.truncf %195 : vector<16x8xf32> to vector<16x8xbf16>
    %c24_102 = arith.constant 24 : index
    %c0_103 = arith.constant 0 : index
    %197 = vector.load %arg10[%c24_102, %c0_103] : memref<32x32xbf16, #tpu.memory_space<vmem>>, vector<8x32xbf16>
    %cst_104 = arith.constant dense<0.000000e+00> : vector<16x32xf32>
    %198 = tpu.matmul %196, %197, %cst_104 {dimension_numbers = #tpu.dot_dimension_numbers<[1], [0], [0], [1], [0, 0, 1, 1], [], []>} : vector<16x8xbf16>, vector<8x32xbf16>, vector<16x32xf32> -> vector<16x32xf32>
    %199 = arith.addf %156, %198 : vector<16x32xf32>
    %c0_105 = arith.constant 0 : index
    %c0_106 = arith.constant 0 : index
    %200 = vector.load %arg11[%c0_105, %c0_106] : memref<1x32xf32, #tpu.memory_space<vmem>>, vector<1x32xf32>
    %201 = vector.broadcast %200 : vector<1x32xf32> to vector<16x32xf32>
    %202 = arith.addf %199, %201 : vector<16x32xf32>
    %c0_107 = arith.constant 0 : index
    %c0_108 = arith.constant 0 : index
    %203 = vector.load %arg18[%c0_107, %c0_108] : memref<1x32xf32, #tpu.memory_space<vmem>>, vector<1x32xf32>
    %204 = vector.broadcast %203 : vector<1x32xf32> to vector<16x32xf32>
    %205 = arith.mulf %204, %202 : vector<16x32xf32>
    %206 = arith.addf %1, %205 : vector<16x32xf32>
    %cst_109 = arith.constant dense<0.000000e+00> : vector<16xf32>
    %207 = vector.multi_reduction <add>, %206, %cst_109 [1] : vector<16x32xf32> to vector<16xf32>
    %208 = vector.shape_cast %207 : vector<16xf32> to vector<16x1xf32>
    %cst_110 = arith.constant 3.200000e+01 : f32
    %209 = vector.broadcast %cst_110 : f32 to vector<16x1xf32>
    %210 = arith.divf %208, %209 : vector<16x1xf32>
    %211 = vector.broadcast %210 : vector<16x1xf32> to vector<16x32xf32>
    %212 = arith.subf %206, %211 : vector<16x32xf32>
    %213 = arith.mulf %212, %212 : vector<16x32xf32>
    %cst_111 = arith.constant dense<0.000000e+00> : vector<16xf32>
    %214 = vector.multi_reduction <add>, %213, %cst_111 [1] : vector<16x32xf32> to vector<16xf32>
    %215 = vector.shape_cast %214 : vector<16xf32> to vector<16x1xf32>
    %cst_112 = arith.constant 3.200000e+01 : f32
    %216 = vector.broadcast %cst_112 : f32 to vector<16x1xf32>
    %217 = arith.divf %215, %216 : vector<16x1xf32>
    %218 = vector.broadcast %210 : vector<16x1xf32> to vector<16x32xf32>
    %219 = arith.subf %206, %218 : vector<16x32xf32>
    %cst_113 = arith.constant 9.99999974E-6 : f32
    %220 = vector.broadcast %cst_113 : f32 to vector<16x1xf32>
    %221 = arith.addf %217, %220 : vector<16x1xf32>
    %222 = math.rsqrt %221 : vector<16x1xf32>
    %223 = vector.broadcast %222 : vector<16x1xf32> to vector<16x32xf32>
    %224 = arith.mulf %219, %223 : vector<16x32xf32>
    %c0_114 = arith.constant 0 : index
    %c0_115 = arith.constant 0 : index
    %225 = vector.load %arg12[%c0_114, %c0_115] : memref<1x32xf32, #tpu.memory_space<vmem>>, vector<1x32xf32>
    %226 = vector.broadcast %225 : vector<1x32xf32> to vector<16x32xf32>
    %227 = arith.mulf %224, %226 : vector<16x32xf32>
    %c0_116 = arith.constant 0 : index
    %c0_117 = arith.constant 0 : index
    %228 = vector.load %arg13[%c0_116, %c0_117] : memref<1x32xf32, #tpu.memory_space<vmem>>, vector<1x32xf32>
    %229 = vector.broadcast %228 : vector<1x32xf32> to vector<16x32xf32>
    %230 = arith.addf %227, %229 : vector<16x32xf32>
    %231 = arith.truncf %230 : vector<16x32xf32> to vector<16x32xbf16>
    %c0_118 = arith.constant 0 : index
    %c0_119 = arith.constant 0 : index
    %232 = vector.load %arg14[%c0_118, %c0_119] : memref<32x128xbf16, #tpu.memory_space<vmem>>, vector<32x128xbf16>
    %cst_120 = arith.constant dense<0.000000e+00> : vector<16x128xf32>
    %233 = tpu.matmul %231, %232, %cst_120 {dimension_numbers = #tpu.dot_dimension_numbers<[1], [0], [0], [1], [0, 0, 1, 1], [], []>} : vector<16x32xbf16>, vector<32x128xbf16>, vector<16x128xf32> -> vector<16x128xf32>
    %c0_121 = arith.constant 0 : index
    %c0_122 = arith.constant 0 : index
    %234 = vector.load %arg15[%c0_121, %c0_122] : memref<1x128xf32, #tpu.memory_space<vmem>>, vector<1x128xf32>
    %235 = vector.broadcast %234 : vector<1x128xf32> to vector<16x128xf32>
    %236 = arith.addf %233, %235 : vector<16x128xf32>
    %cst_123 = arith.constant 5.000000e-01 : f32
    %237 = vector.broadcast %cst_123 : f32 to vector<16x128xf32>
    %238 = arith.mulf %237, %236 : vector<16x128xf32>
    %cst_124 = arith.constant 2.000000e+00 : f32
    %239 = math.sqrt %cst_124 : f32
    %cst_125 = arith.constant 1.000000e+00 : f32
    %240 = arith.divf %cst_125, %239 : f32
    %241 = vector.broadcast %240 : f32 to vector<16x128xf32>
    %242 = arith.mulf %236, %241 : vector<16x128xf32>
    %243 = math.erf %242 : vector<16x128xf32>
    %cst_126 = arith.constant 1.000000e+00 : f32
    %244 = vector.broadcast %cst_126 : f32 to vector<16x128xf32>
    %245 = arith.addf %244, %243 : vector<16x128xf32>
    %246 = arith.mulf %238, %245 : vector<16x128xf32>
    %247 = arith.truncf %246 : vector<16x128xf32> to vector<16x128xbf16>
    %c0_127 = arith.constant 0 : index
    %c0_128 = arith.constant 0 : index
    %248 = vector.load %arg16[%c0_127, %c0_128] : memref<128x32xbf16, #tpu.memory_space<vmem>>, vector<128x32xbf16>
    %cst_129 = arith.constant dense<0.000000e+00> : vector<16x32xf32>
    %249 = tpu.matmul %247, %248, %cst_129 {dimension_numbers = #tpu.dot_dimension_numbers<[1], [0], [0], [1], [0, 0, 1, 1], [], []>} : vector<16x128xbf16>, vector<128x32xbf16>, vector<16x32xf32> -> vector<16x32xf32>
    %c0_130 = arith.constant 0 : index
    %c0_131 = arith.constant 0 : index
    %250 = vector.load %arg17[%c0_130, %c0_131] : memref<1x32xf32, #tpu.memory_space<vmem>>, vector<1x32xf32>
    %251 = vector.broadcast %250 : vector<1x32xf32> to vector<16x32xf32>
    %252 = arith.addf %249, %251 : vector<16x32xf32>
    %c0_132 = arith.constant 0 : index
    %c0_133 = arith.constant 0 : index
    %253 = vector.load %arg19[%c0_132, %c0_133] : memref<1x32xf32, #tpu.memory_space<vmem>>, vector<1x32xf32>
    %254 = vector.broadcast %253 : vector<1x32xf32> to vector<16x32xf32>
    %255 = arith.mulf %254, %252 : vector<16x32xf32>
    %256 = arith.addf %206, %255 : vector<16x32xf32>
    %257 = vector.shape_cast %256 : vector<16x32xf32> to vector<2x8x32xf32>
    %c0_134 = arith.constant 0 : index
    %c0_135 = arith.constant 0 : index
    %c0_136 = arith.constant 0 : index
    %258 = vector.load %arg20[%c0_134, %c0_135, %c0_136] : memref<2x8x32xf32, #tpu.memory_space<vmem>>, vector<2x8x32xf32>
    tpu.vector_store %arg20[%c0_134, %c0_135, %c0_136], %257 {strides = array<i32>} : memref<2x8x32xf32, #tpu.memory_space<vmem>>, vector<2x8x32xf32>,
    return
  }
  func.func @transform_0(%arg0: i32) -> (i32, i32, i32) {
    %c0_i32 = arith.constant 0 : i32
    %c0_i32_0 = arith.constant 0 : i32
    %c0_i32_1 = arith.constant 0 : i32
    return %arg0, %c0_i32, %c0_i32_0 : i32, i32, i32
  }
  func.func @transform_1(%arg0: i32) -> (i32, i32) {
    %c0_i32 = arith.constant 0 : i32
    %c0_i32_0 = arith.constant 0 : i32
    %c0_i32_1 = arith.constant 0 : i32
    return %c0_i32, %c0_i32_0 : i32, i32
  }
  func.func @transform_2(%arg0: i32) -> (i32, i32) {
    %c0_i32 = arith.constant 0 : i32
    %c0_i32_0 = arith.constant 0 : i32
    %c0_i32_1 = arith.constant 0 : i32
    return %c0_i32, %c0_i32_0 : i32, i32
  }
  func.func @transform_3(%arg0: i32) -> (i32, i32, i32) {
    %c0_i32 = arith.constant 0 : i32
    %c0_i32_0 = arith.constant 0 : i32
    %c0_i32_1 = arith.constant 0 : i32
    %c0_i32_2 = arith.constant 0 : i32
    return %c0_i32, %c0_i32_0, %c0_i32_1 : i32, i32, i32
  }
  func.func @transform_4(%arg0: i32) -> (i32, i32) {
    %c0_i32 = arith.constant 0 : i32
    %c0_i32_0 = arith.constant 0 : i32
    %c0_i32_1 = arith.constant 0 : i32
    return %c0_i32, %c0_i32_0 : i32, i32
  }
  func.func @transform_5(%arg0: i32) -> (i32, i32, i32) {
    %c0_i32 = arith.constant 0 : i32
    %c0_i32_0 = arith.constant 0 : i32
    %c0_i32_1 = arith.constant 0 : i32
    %c0_i32_2 = arith.constant 0 : i32
    return %c0_i32, %c0_i32_0, %c0_i32_1 : i32, i32, i32
  }
  func.func @transform_6(%arg0: i32) -> (i32, i32) {
    %c0_i32 = arith.constant 0 : i32
    %c0_i32_0 = arith.constant 0 : i32
    %c0_i32_1 = arith.constant 0 : i32
    return %c0_i32, %c0_i32_0 : i32, i32
  }
  func.func @transform_7(%arg0: i32) -> (i32, i32, i32) {
    %c0_i32 = arith.constant 0 : i32
    %c0_i32_0 = arith.constant 0 : i32
    %c0_i32_1 = arith.constant 0 : i32
    %c0_i32_2 = arith.constant 0 : i32
    return %c0_i32, %c0_i32_0, %c0_i32_1 : i32, i32, i32
  }
  func.func @transform_8(%arg0: i32) -> (i32, i32) {
    %c0_i32 = arith.constant 0 : i32
    %c0_i32_0 = arith.constant 0 : i32
    %c0_i32_1 = arith.constant 0 : i32
    return %c0_i32, %c0_i32_0 : i32, i32
  }
  func.func @transform_9(%arg0: i32) -> (i32, i32) {
    %c0_i32 = arith.constant 0 : i32
    %c0_i32_0 = arith.constant 0 : i32
    %c0_i32_1 = arith.constant 0 : i32
    return %c0_i32, %c0_i32_0 : i32, i32
  }
  func.func @transform_10(%arg0: i32) -> (i32, i32) {
    %c0_i32 = arith.constant 0 : i32
    %c0_i32_0 = arith.constant 0 : i32
    %c0_i32_1 = arith.constant 0 : i32
    return %c0_i32, %c0_i32_0 : i32, i32
  }
  func.func @transform_11(%arg0: i32) -> (i32, i32) {
    %c0_i32 = arith.constant 0 : i32
    %c0_i32_0 = arith.constant 0 : i32
    %c0_i32_1 = arith.constant 0 : i32
    return %c0_i32, %c0_i32_0 : i32, i32
  }
  func.func @transform_12(%arg0: i32) -> (i32, i32) {
    %c0_i32 = arith.constant 0 : i32
    %c0_i32_0 = arith.constant 0 : i32
    %c0_i32_1 = arith.constant 0 : i32
    return %c0_i32, %c0_i32_0 : i32, i32
  }
  func.func @transform_13(%arg0: i32) -> (i32, i32) {
    %c0_i32 = arith.constant 0 : i32
    %c0_i32_0 = arith.constant 0 : i32
    %c0_i32_1 = arith.constant 0 : i32
    return %c0_i32, %c0_i32_0 : i32, i32
  }
  func.func @transform_14(%arg0: i32) -> (i32, i32) {
    %c0_i32 = arith.constant 0 : i32
    %c0_i32_0 = arith.constant 0 : i32
    %c0_i32_1 = arith.constant 0 : i32
    return %c0_i32, %c0_i32_0 : i32, i32
  }
  func.func @transform_15(%arg0: i32) -> (i32, i32) {
    %c0_i32 = arith.constant 0 : i32
    %c0_i32_0 = arith.constant 0 : i32
    %c0_i32_1 = arith.constant 0 : i32
    return %c0_i32, %c0_i32_0 : i32, i32
  }
  func.func @transform_16(%arg0: i32) -> (i32, i32) {
    %c0_i32 = arith.constant 0 : i32
    %c0_i32_0 = arith.constant 0 : i32
    %c0_i32_1 = arith.constant 0 : i32
    return %c0_i32, %c0_i32_0 : i32, i32
  }
  func.func @transform_17(%arg0: i32) -> (i32, i32) {
    %c0_i32 = arith.constant 0 : i32
    %c0_i32_0 = arith.constant 0 : i32
    %c0_i32_1 = arith.constant 0 : i32
    return %c0_i32, %c0_i32_0 : i32, i32
  }
  func.func @transform_18(%arg0: i32) -> (i32, i32) {
    %c0_i32 = arith.constant 0 : i32
    %c0_i32_0 = arith.constant 0 : i32
    %c0_i32_1 = arith.constant 0 : i32
    return %c0_i32, %c0_i32_0 : i32, i32
  }
  func.func @transform_19(%arg0: i32) -> (i32, i32, i32) {
    %c0_i32 = arith.constant 0 : i32
    %c0_i32_0 = arith.constant 0 : i32
    %c0_i32_1 = arith.constant 0 : i32
    return %arg0, %c0_i32, %c0_i32_0 : i32, i32, i32
  }
}

</mosaic_0001>

<bundles_post_ra>
// kernel: tpu_custom_call.1
= control target key start
LH: loop header
LB: loop body
LE: loop exit
PB: predicated region body
PF: predicated region fallthrough
CT: control target
= control target key end

     0   :  { %s3969_s0 = inlined_call_operand.hbm [shape: f32[2,8,32], index: 0, kind: input, shape index: {}]   ;;  %s3970_s1 = inlined_call_operand.hbm [shape: f32[1,32], index: 1, kind: input, shape index: {}]   ;;  %s3971_s2 = inlined_call_operand.hbm [shape: f32[1,32], index: 2, kind: input, shape index: {}]   ;;  %s3972_s3 = inlined_call_operand.hbm [shape: bf16[4,8,8], index: 3, kind: input, shape index: {}]   ;;  %s3973_s4 = inlined_call_operand.hbm [shape: f32[1,32], index: 4, kind: input, shape index: {}]   ;;  %s3974_s5 = inlined_call_operand.hbm [shape: bf16[4,8,8], index: 5, kind: input, shape index: {}]   ;;  %s3975_s6 = inlined_call_operand.hbm [shape: f32[1,32], index: 6, kind: input, shape index: {}]   ;;  %s3976_s7 = inlined_call_operand.hbm [shape: bf16[4,8,8], index: 7, kind: input, shape index: {}]   ;;  %s3977_s8 = inlined_call_operand.hbm [shape: f32[1,32], index: 8, kind: input, shape index: {}]   ;;  %s3978_s9 = inlined_call_operand.hbm [shape: bf16[32,32], index: 9, kind: input, shape index: {}]   ;;  %s3979_s10 = inlined_call_operand.hbm [shape: f32[1,32], index: 10, kind: input, shape index: {}]   ;;  %s3980_s11 = inlined_call_operand.hbm [shape: f32[1,32], index: 11, kind: input, shape index: {}]   ;;  %s3981_s12 = inlined_call_operand.hbm [shape: f32[1,32], index: 12, kind: input, shape index: {}]   ;;  %s3982_s13 = inlined_call_operand.hbm [shape: bf16[32,128], index: 13, kind: input, shape index: {}]   ;;  %s3983_s14 = inlined_call_operand.hbm [shape: f32[1,128], index: 14, kind: input, shape index: {}]   ;;  %s3984_s15 = inlined_call_operand.hbm [shape: bf16[128,32], index: 15, kind: input, shape index: {}]   ;;  %s3985_s16 = inlined_call_operand.hbm [shape: f32[1,32], index: 16, kind: input, shape index: {}]   ;;  %s3986_s17 = inlined_call_operand.hbm [shape: f32[1,32], index: 17, kind: input, shape index: {}]   ;;  %s3987_s18 = inlined_call_operand.hbm [shape: f32[1,32], index: 18, kind: input, shape index: {}]   ;;  %s3988_s19 = inlined_call_operand.hbm [shape: f32[2,8,32], index: 19, kind: output, shape index: {}]  }
   0x1   :  { %3995 = sst [smem:[#allocation44_spill]] %s3969_s0 }
   0x2   :  { %3996 = sst [smem:[#allocation45_spill]] %s3970_s1 }
   0x3   :  { %3997 = sst [smem:[#allocation46_spill]] %s3971_s2 }
   0x4   :  { %3998 = sst [smem:[#allocation47_spill]] %s3972_s3 }
   0x5   :  { %3999 = sst [smem:[#allocation48_spill]] %s3987_s18 }
   0x6   :  { %4000 = sst [smem:[#allocation49_spill]] %s3988_s19 }
   0x7   :  { %24 = vsyncpa [#allocation3], 0 }
   0x8   :  { %25 = vsyncpa [#allocation6], 0 }
   0x9   :  { %26 = vsyncpa [#allocation9], 0 }
   0xa   :  { %27 = vsyncpa [#allocation12], 0 }
   0xb   :  { %28 = vsyncpa [#allocation15], 0 }
   0xc   :  { %29 = vsyncpa [#allocation18], 0 }
   0xd   :  { %30 = vsyncpa [#allocation21], 0 }
   0xe   :  { %31 = vsyncpa [#allocation24], 0 }
   0xf   :  { %32 = vsyncpa [#allocation27], 0 }
  0x10   :  { %33 = vsyncpa [#allocation30], 0 }
  0x11   :  { %34 = vsyncpa [#allocation4], 0  ;;  %s3275_s0 = smov [#allocation5]   ;;  %s3276_s20 = smov [#allocation8]  }
  0x12   :  { %s53_s30 = sshll.u32 %s3275_s0, 4  ;;  %s72_s21 = sshll.u32 %s3276_s20, 4  ;;  %s54_s30 = int_to_ptr.vmem [resolvable:$true] %s53_s30  ;;  %s3404_s21 = int_to_ptr.vmem [resolvable:$true] %s72_s21 }
  0x13   :  { %s4001_s2 = sld [smem:[#allocation45_spill]] }
  0x19   :  { %s2813_s23 = scalar_lea.hbm %s4001_s2, 16 }
  0x1a   :  { %p2814_p0 = scmp.ne.s32.totalorder %s4001_s2, %s2813_s23  ;;  %p2817_p1 = scmp.lt.u32.totalorder %s2813_s23, %s4001_s2 }
  0x1c   :  { %p2819_p2 = pnand %p2817_p1, %p2814_p0 }
  0x1e   :  { %2822 = shalt.err (!%p2819_p2)
}
  0x1f   :  { %s2823_s27 = scalar_lea.vmem %s54_s30, 16  ;;  %s2827_s28 = scalar_lea.vmem %s54_s30, 32 }
  0x20   :  { %p2824_p3 = scmp.ne.s32.totalorder %s54_s30, %s2823_s27  ;;  %p2828_p4 = scmp.lt.s32.totalorder %s54_s30, %s54_s30 }
  0x21   :  { %p2829_p5 = scmp.lt.s32.totalorder %s2827_s28, %s2823_s27 }
  0x23   :  { %p2830_p6 = por %p2829_p5, %p2828_p4 }
  0x25   :  { %p2831_p7 = pnand %p2830_p6, %p2824_p3 }
  0x27   :  { %2834 = shalt.err (!%p2831_p7)
}
  0x28   :  { %56 = dma.hbm_to_vmem [thread:$0]  %s4001_s2, 16, %s54_s30, [#allocation6]  }
  0x29   :  { %s4002_s22 = sld [smem:[#allocation47_spill]] }
  0x2f   :  { %s2835_s24 = scalar_lea.hbm %s4002_s22, 256 }
  0x30   :  { %p2836_p8 = scmp.ne.s32.totalorder %s4002_s22, %s2835_s24  ;;  %p2839_p9 = scmp.lt.u32.totalorder %s2835_s24, %s4002_s22 }
  0x32   :  { %p2841_p10 = pnand %p2839_p9, %p2836_p8 }
  0x34   :  { %2844 = shalt.err (!%p2841_p10)
}
  0x35   :  { %s2845_s27 = scalar_lea.vmem %s3404_s21, 256  ;;  %p2850_p12 = scmp.lt.s32.totalorder %s3404_s21, %s3404_s21 }
  0x36   :  { %p2846_p11 = scmp.ne.s32.totalorder %s3404_s21, %s2845_s27  ;;  %p2851_p13 = scmp.lt.s32.totalorder %s2845_s27, %s2845_s27 }
  0x38   :  { %p2852_p0 = por %p2851_p13, %p2850_p12 }
  0x3a   :  { %p2853_p1 = pnand %p2852_p0, %p2846_p11 }
  0x3c   :  { %2856 = shalt.err (!%p2853_p1)
}
  0x3d   :  { %s3277_s30 = smov 64   ;;  %s3278_s2 = smov 4  }
  0x3e   :  { %78 = dma.hbm_to_vmem [thread:$0]  %s4002_s22, 256, %s3404_s21, [#allocation9], %s3277_s30, %s3277_s30, %s3278_s2  }
  0x3f   :  { %s3279_s0 = smov [#allocation11]   ;;  %s3280_s1 = smov [#allocation14]  }
  0x40   :  { %s94_s20 = sshll.u32 %s3279_s0, 4  ;;  %s116_s24 = sshll.u32 %s3280_s1, 4  ;;  %s95_s20 = int_to_ptr.vmem [resolvable:$true] %s94_s20  ;;  %s3438_s24 = int_to_ptr.vmem [resolvable:$true] %s116_s24 }
  0x41   :  { %s2857_s3 = scalar_lea.hbm %s3974_s5, 256 }
  0x42   :  { %p2858_p2 = scmp.ne.s32.totalorder %s3974_s5, %s2857_s3  ;;  %p2861_p3 = scmp.lt.u32.totalorder %s2857_s3, %s3974_s5 }
  0x44   :  { %p2863_p4 = pnand %p2861_p3, %p2858_p2 }
  0x46   :  { %2866 = shalt.err (!%p2863_p4)
}
  0x47   :  { %s2867_s21 = scalar_lea.vmem %s95_s20, 256  ;;  %p2872_p6 = scmp.lt.s32.totalorder %s95_s20, %s95_s20 }
  0x48   :  { %p2868_p5 = scmp.ne.s32.totalorder %s95_s20, %s2867_s21  ;;  %p2873_p7 = scmp.lt.s32.totalorder %s2867_s21, %s2867_s21 }
  0x4a   :  { %p2874_p8 = por %p2873_p7, %p2872_p6 }
  0x4c   :  { %p2875_p9 = pnand %p2874_p8, %p2868_p5 }
  0x4e   :  { %2878 = shalt.err (!%p2875_p9)
}
  0x4f   :  { %100 = dma.hbm_to_vmem [thread:$0]  %s3974_s5, 256, %s95_s20, [#allocation12], %s3277_s30, %s3277_s30, %s3278_s2  }
  0x50   :  { %s2879_s18 = scalar_lea.hbm %s3976_s7, 256 }
  0x51   :  { %p2880_p10 = scmp.ne.s32.totalorder %s3976_s7, %s2879_s18  ;;  %p2883_p11 = scmp.lt.u32.totalorder %s2879_s18, %s3976_s7 }
  0x53   :  { %p2885_p12 = pnand %p2883_p11, %p2880_p10 }
  0x55   :  { %2888 = shalt.err (!%p2885_p12)
}
  0x56   :  { %s2889_s3 = scalar_lea.vmem %s3438_s24, 256  ;;  %p2894_p0 = scmp.lt.s32.totalorder %s3438_s24, %s3438_s24 }
  0x57   :  { %p2890_p13 = scmp.ne.s32.totalorder %s3438_s24, %s2889_s3  ;;  %p2895_p1 = scmp.lt.s32.totalorder %s2889_s3, %s2889_s3 }
  0x59   :  { %p2896_p2 = por %p2895_p1, %p2894_p0 }
  0x5b   :  { %p2897_p3 = pnand %p2896_p2, %p2890_p13 }
  0x5d   :  { %2900 = shalt.err (!%p2897_p3)
}
  0x5e   :  { %122 = dma.hbm_to_vmem [thread:$0]  %s3976_s7, 256, %s3438_s24, [#allocation15], %s3277_s30, %s3277_s30, %s3278_s2  }
  0x5f   :  { %s3281_s26 = smov [#allocation17]   ;;  %s3282_s21 = smov [#allocation20]  }
  0x60   :  { %s138_s27 = sshll.u32 %s3281_s26, 4  ;;  %s161_s22 = sshll.u32 %s3282_s21, 4  ;;  %s139_s27 = int_to_ptr.vmem [resolvable:$true] %s138_s27  ;;  %s162_s22 = int_to_ptr.vmem [resolvable:$true] %s161_s22 }
  0x61   :  { %s2901_s0 = scalar_lea.hbm %s3978_s9, 256 }
  0x62   :  { %p2902_p4 = scmp.ne.s32.totalorder %s3978_s9, %s2901_s0  ;;  %p2905_p5 = scmp.lt.u32.totalorder %s2901_s0, %s3978_s9 }
  0x64   :  { %p2907_p6 = pnand %p2905_p5, %p2902_p4 }
  0x66   :  { %2910 = shalt.err (!%p2907_p6)
}
  0x67   :  { %s2911_s7 = scalar_lea.vmem %s139_s27, 256  ;;  %p2916_p8 = scmp.lt.s32.totalorder %s139_s27, %s139_s27 }
  0x68   :  { %p2912_p7 = scmp.ne.s32.totalorder %s139_s27, %s2911_s7  ;;  %p2917_p9 = scmp.lt.s32.totalorder %s2911_s7, %s2911_s7 }
  0x6a   :  { %p2918_p10 = por %p2917_p9, %p2916_p8 }
  0x6c   :  { %p2919_p11 = pnand %p2918_p10, %p2912_p7 }
  0x6e   :  { %2922 = shalt.err (!%p2919_p11)
}
  0x6f   :  { %144 = dma.hbm_to_vmem [thread:$0]  %s3978_s9, 256, %s139_s27, [#allocation18], %s3277_s30, %s3277_s30, %s3278_s2  }
  0x70   :  { %s2923_s20 = scalar_lea.hbm %s3980_s11, 16 }
  0x71   :  { %p2924_p12 = scmp.ne.s32.totalorder %s3980_s11, %s2923_s20  ;;  %p2927_p13 = scmp.lt.u32.totalorder %s2923_s20, %s3980_s11 }
  0x73   :  { %p2929_p0 = pnand %p2927_p13, %p2924_p12 }
  0x75   :  { %2932 = shalt.err (!%p2929_p0)
}
  0x76   :  { %s2933_s0 = scalar_lea.vmem %s162_s22, 16  ;;  %s2937_s18 = scalar_lea.vmem %s162_s22, 32 }
  0x77   :  { %p2934_p1 = scmp.ne.s32.totalorder %s162_s22, %s2933_s0  ;;  %p2938_p2 = scmp.lt.s32.totalorder %s162_s22, %s162_s22 }
  0x78   :  { %p2939_p3 = scmp.lt.s32.totalorder %s2937_s18, %s2933_s0 }
  0x7a   :  { %p2940_p4 = por %p2939_p3, %p2938_p2 }
  0x7c   :  { %p2941_p5 = pnand %p2940_p4, %p2934_p1 }
  0x7e   :  { %2944 = shalt.err (!%p2941_p5)
}
  0x7f   :  { %164 = dma.hbm_to_vmem [thread:$0]  %s3980_s11, 16, %s162_s22, [#allocation21]  }
  0x80   :  { %s3283_s19 = smov [#allocation23]   ;;  %s3284_s25 = smov [#allocation26]  }
  0x81   :  { %s180_s1 = sshll.u32 %s3283_s19, 4  ;;  %s202_s7 = sshll.u32 %s3284_s25, 4  ;;  %s181_s1 = int_to_ptr.vmem [resolvable:$true] %s180_s1  ;;  %s3502_s7 = int_to_ptr.vmem [resolvable:$true] %s202_s7 }
  0x82   :  { %s2945_s3 = scalar_lea.hbm %s3982_s13, 256 }
  0x83   :  { %p2946_p6 = scmp.ne.s32.totalorder %s3982_s13, %s2945_s3  ;;  %p2949_p7 = scmp.lt.u32.totalorder %s2945_s3, %s3982_s13 }
  0x85   :  { %p2951_p8 = pnand %p2949_p7, %p2946_p6 }
  0x87   :  { %2954 = shalt.err (!%p2951_p8)
}
  0x88   :  { %s2955_s11 = scalar_lea.vmem %s181_s1, 256  ;;  %p2960_p10 = scmp.lt.s32.totalorder %s181_s1, %s181_s1 }
  0x89   :  { %p2956_p9 = scmp.ne.s32.totalorder %s181_s1, %s2955_s11  ;;  %p2961_p11 = scmp.lt.s32.totalorder %s2955_s11, %s2955_s11 }
  0x8b   :  { %p2962_p12 = por %p2961_p11, %p2960_p10 }
  0x8d   :  { %p2963_p13 = pnand %p2962_p12, %p2956_p9 }
  0x8f   :  { %2966 = shalt.err (!%p2963_p13)
}
  0x90   :  { %186 = dma.hbm_to_vmem [thread:$0]  %s3982_s13, 256, %s181_s1, [#allocation24], %s3277_s30, %s3277_s30, %s3278_s2  }
  0x91   :  { %s2967_s18 = scalar_lea.hbm %s3984_s15, 1024 }
  0x92   :  { %p2968_p0 = scmp.ne.s32.totalorder %s3984_s15, %s2967_s18  ;;  %p2971_p1 = scmp.lt.u32.totalorder %s2967_s18, %s3984_s15 }
  0x94   :  { %p2973_p2 = pnand %p2971_p1, %p2968_p0 }
  0x96   :  { %2976 = shalt.err (!%p2973_p2)
}
  0x97   :  { %s2977_s24 = scalar_lea.vmem %s3502_s7, 1024  ;;  %p2982_p4 = scmp.lt.s32.totalorder %s3502_s7, %s3502_s7 }
  0x98   :  { %p2978_p3 = scmp.ne.s32.totalorder %s3502_s7, %s2977_s24  ;;  %p2983_p5 = scmp.lt.s32.totalorder %s2977_s24, %s2977_s24 }
  0x9a   :  { %p2984_p6 = por %p2983_p5, %p2982_p4 }
  0x9c   :  { %p2985_p7 = pnand %p2984_p6, %p2978_p3 }
  0x9e   :  { %2988 = shalt.err (!%p2985_p7)
}
  0x9f   :  { %208 = dma.hbm_to_vmem [thread:$0]  %s3984_s15, 1024, %s3502_s7, [#allocation27], %s3277_s30, %s3277_s30, %s3278_s2  }
  0xa0   :  { %s3285_s23 = smov [#allocation29]   ;;  %s3286_s5 = smov [#allocation2]  }
  0xa1   :  { %s225_s3 = sshll.u32 %s3285_s23, 4  ;;  %s40_s20 = sshll.u32 %s3286_s5, 4  ;;  %s226_s3 = int_to_ptr.vmem [resolvable:$true] %s225_s3  ;;  %s3539_s20 = int_to_ptr.vmem [resolvable:$true] %s40_s20 }
  0xa2   :  { %s2989_s11 = scalar_lea.hbm %s3986_s17, 16 }
  0xa3   :  { %p2990_p8 = scmp.ne.s32.totalorder %s3986_s17, %s2989_s11  ;;  %p2993_p9 = scmp.lt.u32.totalorder %s2989_s11, %s3986_s17 }
  0xa5   :  { %p2995_p10 = pnand %p2993_p9, %p2990_p8 }
  0xa7   :  { %2998 = shalt.err (!%p2995_p10)
}
  0xa8   :  { %s2999_s15 = scalar_lea.vmem %s226_s3, 16  ;;  %s3003_s30 = scalar_lea.vmem %s226_s3, 32 }
  0xa9   :  { %p3000_p11 = scmp.ne.s32.totalorder %s226_s3, %s2999_s15  ;;  %p3004_p12 = scmp.lt.s32.totalorder %s226_s3, %s226_s3 }
  0xaa   :  { %p3005_p13 = scmp.lt.s32.totalorder %s3003_s30, %s2999_s15 }
  0xac   :  { %p3006_p0 = por %p3005_p13, %p3004_p12 }
  0xae   :  { %p3007_p1 = pnand %p3006_p0, %p3000_p11 }
  0xb0   :  { %3010 = shalt.err (!%p3007_p1)
}
  0xb1   :  { %228 = dma.hbm_to_vmem [thread:$0]  %s3986_s17, 16, %s226_s3, [#allocation30]  }
  0xb2   :  { %s4003_s27 = sld [smem:[#allocation44_spill]] }
  0xb8   :  { %s3011_s19 = scalar_lea.hbm %s4003_s27, 256 }
  0xb9   :  { %p3012_p2 = scmp.ne.s32.totalorder %s4003_s27, %s3011_s19  ;;  %p3015_p3 = scmp.lt.u32.totalorder %s3011_s19, %s4003_s27 }
  0xbb   :  { %p3017_p4 = pnand %p3015_p3, %p3012_p2 }
  0xbd   :  { %3020 = shalt.err (!%p3017_p4)
}
  0xbe   :  { %s3021_s23 = scalar_lea.vmem %s3539_s20, 256  ;;  %p3026_p6 = scmp.lt.s32.totalorder %s3539_s20, %s3539_s20 }
  0xbf   :  { %p3022_p5 = scmp.ne.s32.totalorder %s3539_s20, %s3021_s23  ;;  %p3027_p7 = scmp.lt.s32.totalorder %s3021_s23, %s3021_s23 }
  0xc1   :  { %p3028_p8 = por %p3027_p7, %p3026_p6 }
  0xc3   :  { %p3029_p9 = pnand %p3028_p8, %p3022_p5 }
  0xc5   :  { %3032 = shalt.err (!%p3029_p9)
}
  0xc6   :  { %s3287_s17 = smov 128   ;;  %s3288_s3 = smov 8  }
  0xc7   :  { %46 = dma.hbm_to_vmem [thread:$0]  %s4003_s27, 256, %s3539_s20, [#allocation3], %s3287_s17, %s3287_s17, %s3288_s3  }
  0xc8   :  { %s3289_s21 = smov [#allocation7]   ;;  %s3290_s22 = smov [#allocation10]  }
  0xc9   :  { %s63_s11 = sshll.u32 %s3289_s21, 4  ;;  %s85_s28 = sshll.u32 %s3290_s22, 4  ;;  %s64_s11 = int_to_ptr.vmem [resolvable:$true] %s63_s11  ;;  %s86_s28 = int_to_ptr.vmem [resolvable:$true] %s85_s28 }
  0xca   :  { %s4004_s15 = sld [smem:[#allocation46_spill]] }
  0xd0   :  { %s3033_s30 = scalar_lea.hbm %s4004_s15, 16 }
  0xd1   :  { %p3034_p10 = scmp.ne.s32.totalorder %s4004_s15, %s3033_s30  ;;  %p3037_p11 = scmp.lt.u32.totalorder %s3033_s30, %s4004_s15 }
  0xd3   :  { %p3039_p12 = pnand %p3037_p11, %p3034_p10 }
  0xd5   :  { %3042 = shalt.err (!%p3039_p12)
}
  0xd6   :  { %s3043_s20 = scalar_lea.vmem %s64_s11, 16  ;;  %s3047_s27 = scalar_lea.vmem %s64_s11, 32 }
  0xd7   :  { %p3044_p13 = scmp.ne.s32.totalorder %s64_s11, %s3043_s20  ;;  %p3048_p0 = scmp.lt.s32.totalorder %s64_s11, %s64_s11 }
  0xd8   :  { %p3049_p1 = scmp.lt.s32.totalorder %s3047_s27, %s3043_s20 }
  0xda   :  { %p3050_p2 = por %p3049_p1, %p3048_p0 }
  0xdc   :  { %p3051_p3 = pnand %p3050_p2, %p3044_p13 }
  0xde   :  { %3054 = shalt.err (!%p3051_p3)
}
  0xdf   :  { %66 = dma.hbm_to_vmem [thread:$0]  %s4004_s15, 16, %s64_s11, [#allocation6]  }
  0xe0   :  { %s3055_s1 = scalar_lea.hbm %s3973_s4, 16 }
  0xe1   :  { %p3056_p4 = scmp.ne.s32.totalorder %s3973_s4, %s3055_s1  ;;  %p3059_p5 = scmp.lt.u32.totalorder %s3055_s1, %s3973_s4 }
  0xe3   :  { %p3061_p6 = pnand %p3059_p5, %p3056_p4 }
  0xe5   :  { %3064 = shalt.err (!%p3061_p6)
}
  0xe6   :  { %s3065_s22 = scalar_lea.vmem %s86_s28, 16  ;;  %s3069_s29 = scalar_lea.vmem %s86_s28, 32 }
  0xe7   :  { %p3066_p7 = scmp.ne.s32.totalorder %s86_s28, %s3065_s22  ;;  %p3070_p8 = scmp.lt.s32.totalorder %s86_s28, %s86_s28 }
  0xe8   :  { %p3071_p9 = scmp.lt.s32.totalorder %s3069_s29, %s3065_s22 }
  0xea   :  { %p3072_p10 = por %p3071_p9, %p3070_p8 }
  0xec   :  { %p3073_p11 = pnand %p3072_p10, %p3066_p7 }
  0xee   :  { %3076 = shalt.err (!%p3073_p11)
}
  0xef   :  { %88 = dma.hbm_to_vmem [thread:$0]  %s3973_s4, 16, %s86_s28, [#allocation9]  }
  0xf0   :  { %s3291_s15 = smov [#allocation13]   ;;  %s3292_s2 = smov [#allocation16]  }
  0xf1   :  { %s107_s30 = sshll.u32 %s3291_s15, 4  ;;  %s129_s7 = sshll.u32 %s3292_s2, 4  ;;  %s108_s30 = int_to_ptr.vmem [resolvable:$true] %s107_s30  ;;  %s130_s7 = int_to_ptr.vmem [resolvable:$true] %s129_s7 }
  0xf2   :  { %s3077_s20 = scalar_lea.hbm %s3975_s6, 16 }
  0xf3   :  { %p3078_p12 = scmp.ne.s32.totalorder %s3975_s6, %s3077_s20  ;;  %p3081_p13 = scmp.lt.u32.totalorder %s3077_s20, %s3975_s6 }
  0xf5   :  { %p3083_p0 = pnand %p3081_p13, %p3078_p12 }
  0xf7   :  { %3086 = shalt.err (!%p3083_p0)
}
  0xf8   :  { %s3087_s4 = scalar_lea.vmem %s108_s30, 16  ;;  %s3091_s28 = scalar_lea.vmem %s108_s30, 32 }
  0xf9   :  { %p3088_p1 = scmp.ne.s32.totalorder %s108_s30, %s3087_s4  ;;  %p3092_p2 = scmp.lt.s32.totalorder %s108_s30, %s108_s30 }
  0xfa   :  { %p3093_p3 = scmp.lt.s32.totalorder %s3091_s28, %s3087_s4 }
  0xfc   :  { %p3094_p4 = por %p3093_p3, %p3092_p2 }
  0xfe   :  { %p3095_p5 = pnand %p3094_p4, %p3088_p1 }
 0x100   :  { %3098 = shalt.err (!%p3095_p5)
}
 0x101   :  { %110 = dma.hbm_to_vmem [thread:$0]  %s3975_s6, 16, %s108_s30, [#allocation12]  }
 0x102   :  { %s3099_s26 = scalar_lea.hbm %s3977_s8, 16 }
 0x103   :  { %p3100_p6 = scmp.ne.s32.totalorder %s3977_s8, %s3099_s26  ;;  %p3103_p7 = scmp.lt.u32.totalorder %s3099_s26, %s3977_s8 }
 0x105   :  { %p3105_p8 = pnand %p3103_p7, %p3100_p6 }
 0x107   :  { %3108 = shalt.err (!%p3105_p8)
}
 0x108   :  { %s3109_s0 = scalar_lea.vmem %s130_s7, 16  ;;  %s3113_s15 = scalar_lea.vmem %s130_s7, 32 }
 0x109   :  { %p3110_p9 = scmp.ne.s32.totalorder %s130_s7, %s3109_s0  ;;  %p3114_p10 = scmp.lt.s32.totalorder %s130_s7, %s130_s7 }
 0x10a   :  { %p3115_p11 = scmp.lt.s32.totalorder %s3113_s15, %s3109_s0 }
 0x10c   :  { %p3116_p12 = por %p3115_p11, %p3114_p10 }
 0x10e   :  { %p3117_p13 = pnand %p3116_p12, %p3110_p9 }
 0x110   :  { %3120 = shalt.err (!%p3117_p13)
}
 0x111   :  { %132 = dma.hbm_to_vmem [thread:$0]  %s3977_s8, 16, %s130_s7, [#allocation15]  }
 0x112   :  { %s3293_s2 = smov [#allocation19]   ;;  %s3294_s9 = smov [#allocation22]  }
 0x113   :  { %s151_s18 = sshll.u32 %s3293_s2, 4  ;;  %s171_s20 = sshll.u32 %s3294_s9, 4  ;;  %s152_s18 = int_to_ptr.vmem [resolvable:$true] %s151_s18  ;;  %s172_s20 = int_to_ptr.vmem [resolvable:$true] %s171_s20 }
 0x114   :  { %s3121_s25 = scalar_lea.hbm %s3979_s10, 16 }
 0x115   :  { %p3122_p0 = scmp.ne.s32.totalorder %s3979_s10, %s3121_s25  ;;  %p3125_p1 = scmp.lt.u32.totalorder %s3121_s25, %s3979_s10 }
 0x117   :  { %p3127_p2 = pnand %p3125_p1, %p3122_p0 }
 0x119   :  { %3130 = shalt.err (!%p3127_p2)
}
 0x11a   :  { %s3131_s8 = scalar_lea.vmem %s152_s18, 16  ;;  %s3135_s7 = scalar_lea.vmem %s152_s18, 32 }
 0x11b   :  { %p3132_p3 = scmp.ne.s32.totalorder %s152_s18, %s3131_s8  ;;  %p3136_p4 = scmp.lt.s32.totalorder %s152_s18, %s152_s18 }
 0x11c   :  { %p3137_p5 = scmp.lt.s32.totalorder %s3135_s7, %s3131_s8 }
 0x11e   :  { %p3138_p6 = por %p3137_p5, %p3136_p4 }
 0x120   :  { %p3139_p7 = pnand %p3138_p6, %p3132_p3 }
 0x122   :  { %3142 = shalt.err (!%p3139_p7)
}
 0x123   :  { %154 = dma.hbm_to_vmem [thread:$0]  %s3979_s10, 16, %s152_s18, [#allocation18]  }
 0x124   :  { %s3143_s21 = scalar_lea.hbm %s3981_s12, 16 }
 0x125   :  { %p3144_p8 = scmp.ne.s32.totalorder %s3981_s12, %s3143_s21  ;;  %p3147_p9 = scmp.lt.u32.totalorder %s3143_s21, %s3981_s12 }
 0x127   :  { %p3149_p10 = pnand %p3147_p9, %p3144_p8 }
 0x129   :  { %3152 = shalt.err (!%p3149_p10)
}
 0x12a   :  { %s3153_s15 = scalar_lea.vmem %s172_s20, 16  ;;  %s3157_s6 = scalar_lea.vmem %s172_s20, 32 }
 0x12b   :  { %p3154_p11 = scmp.ne.s32.totalorder %s172_s20, %s3153_s15  ;;  %p3158_p12 = scmp.lt.s32.totalorder %s172_s20, %s172_s20 }
 0x12c   :  { %p3159_p13 = scmp.lt.s32.totalorder %s3157_s6, %s3153_s15 }
 0x12e   :  { %p3160_p0 = por %p3159_p13, %p3158_p12 }
 0x130   :  { %p3161_p1 = pnand %p3160_p0, %p3154_p11 }
 0x132   :  { %3164 = shalt.err (!%p3161_p1)
}
 0x133   :  { %174 = dma.hbm_to_vmem [thread:$0]  %s3981_s12, 16, %s172_s20, [#allocation21]  }
 0x134   :  { %s3295_s2 = smov [#allocation25]   ;;  %s3296_s9 = smov [#allocation28]  }
 0x135   :  { %s193_s18 = sshll.u32 %s3295_s2, 4  ;;  %s215_s27 = sshll.u32 %s3296_s9, 4  ;;  %s194_s18 = int_to_ptr.vmem [resolvable:$true] %s193_s18  ;;  %s216_s27 = int_to_ptr.vmem [resolvable:$true] %s215_s27 }
 0x136   :  { %s3165_s24 = scalar_lea.hbm %s3983_s14, 16 }
 0x137   :  { %p3166_p2 = scmp.ne.s32.totalorder %s3983_s14, %s3165_s24  ;;  %p3169_p3 = scmp.lt.u32.totalorder %s3165_s24, %s3983_s14 }
 0x139   :  { %p3171_p4 = pnand %p3169_p3, %p3166_p2 }
 0x13b   :  { %3174 = shalt.err (!%p3171_p4)
}
 0x13c   :  { %s3175_s12 = scalar_lea.vmem %s194_s18, 16  ;;  %s3179_s20 = scalar_lea.vmem %s194_s18, 32 }
 0x13d   :  { %p3176_p5 = scmp.ne.s32.totalorder %s194_s18, %s3175_s12  ;;  %p3180_p6 = scmp.lt.s32.totalorder %s194_s18, %s194_s18 }
 0x13e   :  { %p3181_p7 = scmp.lt.s32.totalorder %s3179_s20, %s3175_s12 }
 0x140   :  { %p3182_p8 = por %p3181_p7, %p3180_p6 }
 0x142   :  { %p3183_p9 = pnand %p3182_p8, %p3176_p5 }
 0x144   :  { %3186 = shalt.err (!%p3183_p9)
}
 0x145   :  { %196 = dma.hbm_to_vmem [thread:$0]  %s3983_s14, 16, %s194_s18, [#allocation24]  }
 0x146   :  { %s3187_s26 = scalar_lea.hbm %s3985_s16, 16 }
 0x147   :  { %p3188_p10 = scmp.ne.s32.totalorder %s3985_s16, %s3187_s26  ;;  %p3191_p11 = scmp.lt.u32.totalorder %s3187_s26, %s3985_s16 }
 0x149   :  { %p3193_p12 = pnand %p3191_p11, %p3188_p10 }
 0x14b   :  { %3196 = shalt.err (!%p3193_p12)
}
 0x14c   :  { %s3197_s0 = scalar_lea.vmem %s216_s27, 16  ;;  %s3201_s15 = scalar_lea.vmem %s216_s27, 32 }
 0x14d   :  { %p3198_p13 = scmp.ne.s32.totalorder %s216_s27, %s3197_s0  ;;  %p3202_p0 = scmp.lt.s32.totalorder %s216_s27, %s216_s27 }
 0x14e   :  { %p3203_p1 = scmp.lt.s32.totalorder %s3201_s15, %s3197_s0 }
 0x150   :  { %p3204_p2 = por %p3203_p1, %p3202_p0 }
 0x152   :  { %p3205_p3 = pnand %p3204_p2, %p3198_p13 }
 0x154   :  { %3208 = shalt.err (!%p3205_p3)
}
 0x155   :  { %218 = dma.hbm_to_vmem [thread:$0]  %s3985_s16, 16, %s216_s27, [#allocation27]  }
 0x156   :  { %s3297_s10 = smov [#allocation31]   ;;  %s4005_s9 = sld [smem:[#allocation48_spill]] }
 0x157   :  { %s235_s30 = sshll.u32 %s3297_s10, 4  ;;  %s236_s30 = int_to_ptr.vmem [resolvable:$true] %s235_s30 }
 0x15c   :  { %s3209_s19 = scalar_lea.hbm %s4005_s9, 16 }
 0x15d   :  { %p3210_p4 = scmp.ne.s32.totalorder %s4005_s9, %s3209_s19  ;;  %p3213_p5 = scmp.lt.u32.totalorder %s3209_s19, %s4005_s9 }
 0x15f   :  { %p3215_p6 = pnand %p3213_p5, %p3210_p4 }
 0x161   :  { %3218 = shalt.err (!%p3215_p6)
}
 0x162   :  { %s3219_s13 = scalar_lea.vmem %s236_s30, 16  ;;  %s3223_s16 = scalar_lea.vmem %s236_s30, 32 }
 0x163   :  { %p3220_p7 = scmp.ne.s32.totalorder %s236_s30, %s3219_s13  ;;  %p3224_p8 = scmp.lt.s32.totalorder %s236_s30, %s236_s30 }
 0x164   :  { %p3225_p9 = scmp.lt.s32.totalorder %s3223_s16, %s3219_s13 }
 0x166   :  { %p3226_p10 = por %p3225_p9, %p3224_p8 }
 0x168   :  { %p3227_p11 = pnand %p3226_p10, %p3220_p7 }
 0x16a   :  { %3230 = shalt.err (!%p3227_p11)
}
 0x16b   :  { %238 = dma.hbm_to_vmem [thread:$0]  %s4005_s9, 16, %s236_s30, [#allocation30]  }
 0x16c   :  { %3253 = dma.done.wait [#allocation3], 256  }
 0x16d   :  { %3254 = vsyncadd [#allocation3], 4294967040 }
 0x16e   :  { %3255 = dma.done.wait [#allocation6], 32  }
 0x16f   :  { %3256 = vsyncadd [#allocation6], 4294967264 }
 0x170   :  { %3257 = dma.done.wait [#allocation9], 272  }
 0x171   :  { %3258 = vsyncadd [#allocation9], 4294967024 }
 0x172   :  { %3259 = dma.done.wait [#allocation12], 272  }
 0x173   :  { %3260 = vsyncadd [#allocation12], 4294967024 }
 0x174   :  { %3261 = dma.done.wait [#allocation15], 272  }
 0x175   :  { %3262 = vsyncadd [#allocation15], 4294967024 }
 0x176   :  { %3263 = dma.done.wait [#allocation18], 272  }
 0x177   :  { %3264 = vsyncadd [#allocation18], 4294967024 }
 0x178   :  { %3265 = dma.done.wait [#allocation21], 32  }
 0x179   :  { %3266 = vsyncadd [#allocation21], 4294967264 }
 0x17a   :  { %3267 = dma.done.wait [#allocation24], 272  }
 0x17b   :  { %3268 = vsyncadd [#allocation24], 4294967024 }
 0x17c   :  { %3269 = dma.done.wait [#allocation27], 1040  }
 0x17d   :  { %3270 = vsyncadd [#allocation27], 4294966256 }
 0x17e   :  { %3271 = dma.done.wait [#allocation30], 32  }
 0x17f   :  { %3272 = vsyncadd [#allocation30], 4294967264  ;;  %vm299_vm0 = vcmask 261120   ;;  %v297_v0 = vld [vmem:[#allocation2] sm:$0xff]  ;;  %v298_v1 = vld [vmem:[#allocation2 + $0x8] sm:$0xff]  ;;  %vm358_vm1 = vcmask 1043456  }
 0x180   :  { %v300_v2 = vsel %vm299_vm0, %v297_v0, 0.0  ;;  %v303_v3 = vsel %vm299_vm0, %v298_v1, 0.0  ;;  %v346_v14 = vld [vmem:[#allocation8] sm:$0xf]  ;;  %v403_v15 = vld [vmem:[#allocation11] sm:$0xf] }
 0x181   :  { %301 = vadd.xlane.f32.xlu0 %v300_v2  ;;  %v3298_v16 = vmov 0.0   ;;  %v360_v17 = vsel %vm358_vm1, %v346_v14, 0  ;;  %v412_v18 = vsel %vm358_vm1, %v403_v15, 0  ;;  %vm3299_vm2 = vmmov 0   ;;  %v2368_v27 = vld [vmem:[#allocation5] ss:$0 sm:$0xff] }
 0x182   :  { %2508 = vmatprep.subr.bf16.mxu0 %v3298_v16  ;;  %2514 = vmatprep.subr.bf16.mxu1 %v3298_v16  ;;  %v2369_v31 = vld [vmem:[#allocation7] ss:$0 sm:$0xff]  ;;  %v455_v33 = vld [vmem:[#allocation14] sm:$0xf]  ;;  %vm354_vm3 = vcmask 64512   ;;  %s3300_s12 = smov 120  }
 0x183   :  { %2509 = vmatpush3.bf16.msra.mxu0 %v360_v17  ;;  %2515 = vmatpush3.bf16.msra.mxu1 %v412_v18  ;;  %v464_v37 = vsel %vm358_vm1, %v455_v33, 0  ;;  %v3711_v38 = vld [vmem:[#allocation13] ss:$0 sm:$0xff]  ;;  %v3714_v49 = vld [vmem:[#allocation10] ss:$0 sm:$0xff]  ;;  %s3301_s20 = smov 112  }
 0x184   :  { %2510 = vmatprep.mubr.msk.bf16.mxu0 %vm3299_vm2, %v3298_v16  ;;  %2516 = vmatprep.mubr.msk.bf16.mxu1 %vm3299_vm2, %v3298_v16  ;;  %v3718_v52 = vld [vmem:[#allocation16] ss:$0 sm:$0xff]  ;;  %s3302_s7 = smov 104   ;;  %s3303_s1 = smov [#allocation32]  }
 0x185   :  { %304 = vadd.xlane.f32.xlu0 %v303_v3  ;;  %2520 = vmatprep.subr.bf16.mxu0 %v3298_v16  ;;  %s2347_s23 = sshll.u32 %s3303_s1, 4  ;;  %s2348_s23 = int_to_ptr.vmem [resolvable:$true] %s2347_s23 }
 0x186   :  { %2538 = vmatprep.subr.bf16.mxu1 %v3298_v16  ;;  %s3231_s5 = scalar_lea.vmem %s2348_s23, 256  ;;  %p3236_p13 = scmp.lt.s32.totalorder %s2348_s23, %s2348_s23 }
 0x187   :  { %p3232_p12 = scmp.ne.s32.totalorder %s2348_s23, %s3231_s5  ;;  %p3237_p0 = scmp.lt.s32.totalorder %s3231_s5, %s3231_s5 }
 0x189   :  { %p3238_p1 = por %p3237_p0, %p3236_p13 }
 0x18b   :  { %p3239_p2 = pnand %p3238_p1, %p3232_p12 }
 0x20e   :  { %v302_v4 = vpop.xlane.xlu0 %301 }
 0x20f   :  { %v307_v5 = vmul.f32 0.03125, %v302_v4 }
 0x211   :  { %v309_v6 = vsub.f32 %v297_v0, %v307_v5 }
 0x212   :  { %v305_v7 = vpop.xlane.xlu0 %304 }
 0x213   :  { %v308_v8 = vmul.f32 0.03125, %v305_v7  ;;  %v311_v9 = vmul.f32 %v309_v6, %v309_v6 }
 0x215   :  { %v310_v10 = vsub.f32 %v298_v1, %v308_v8  ;;  %v313_v11 = vsel %vm299_vm0, %v311_v9, 0.0 }
 0x216   :  { %314 = vadd.xlane.f32.xlu1 %v313_v11 }
 0x217   :  { %v312_v12 = vmul.f32 %v310_v10, %v310_v10 }
 0x219   :  { %v316_v13 = vsel %vm299_vm0, %v312_v12, 0.0 }
 0x21a   :  { %317 = vadd.xlane.f32.xlu1 %v316_v13 }
 0x2a3   :  { %v315_v19 = vpop.xlane.xlu1 %314 }
 0x2a4   :  { %v319_v20 = vmul.f32 0.03125, %v315_v19 }
 0x2a6   :  { %v321_v21 = vadd.f32 1e-05, %v319_v20 }
 0x2a7   :  { %v318_v22 = vpop.xlane.xlu1 %317 }
 0x2a8   :  { %2767 = vrsqrt.f32 %v321_v21  ;;  %v320_v23 = vmul.f32 0.03125, %v318_v22 }
 0x2aa   :  { %v322_v24 = vadd.f32 1e-05, %v320_v23 }
 0x2ac   :  { %2769 = vrsqrt.f32 %v322_v24 }
 0x2b2   :  { %v2768_v25 = vpop.eup %2767 }
 0x2b3   :  { %v325_v26 = vmul.f32 %v2768_v25, %v309_v6 }
 0x2b5   :  { %v334_v29 = vmul.f32 %v2368_v27, %v325_v26 }
 0x2b6   :  { %v2770_v28 = vpop.eup %2769 }
 0x2b7   :  { %v326_v30 = vmul.f32 %v2770_v28, %v310_v10  ;;  %v343_v34 = vadd.f32 %v2369_v31, %v334_v29  ;;  %v724_v29 = vld [vmem:[#allocation8 + $0x4] sm:$0xf] }
 0x2b9   :  { %v335_v32 = vmul.f32 %v2368_v27, %v326_v30 }
 0x2bb   :  { %v344_v35 = vadd.f32 %v2369_v31, %v335_v32  ;;  %v741_v32 = vsel %vm358_vm1, %v724_v29, 0 }
 0x2bd   :  { %v3695_v36 = vpack.c.bf16 %v344_v35, %v343_v34  ;;  %v785_v34 = vld [vmem:[#allocation11 + $0x4] sm:$0xf]  ;;  %v840_v35 = vld [vmem:[#allocation14 + $0x4] sm:$0xf] }
 0x2bf   :  { %2511 = vmatmul.mubr.msk.bf16.vlgmr.msra.gmra.mrb[0].mxu0 %vm354_vm3, %v3695_v36  ;;  %2517 = vmatmul.mubr.msk.bf16.vlgmr.msra.gmra.mrb[0].mxu1 %vm354_vm3, %v3695_v36 }
 0x2c0   :  { %2521 = vmatpush3.bf16.msra.mxu0 %v464_v37  ;;  %2522 = vmatprep.mubr.msk.bf16.mxu0 %vm3299_vm2, %v3298_v16 }
 0x2c1   :  { %2526 = vmatprep.subr.bf16.mxu0 %v3298_v16  ;;  %2540 = vmatprep.mubr.msk.bf16.mxu1 %vm3299_vm2, %v3298_v16 }
 0x2c7   :  { %2523 = vmatmul.mubr.msk.bf16.vlgmr.msra.gmra.mrb[4].mxu0 %vm354_vm3, %v3695_v36 }
 0x2c8   :  { %2528 = vmatprep.mubr.msk.bf16.mxu0 %vm3299_vm2, %v3298_v16 }
 0x392   :  { %v396_v39 = vpop.f32.mrb[0].mxu0  ;;  %v448_v40 = vpop.f32.mrb[0].mxu1 }
 0x393   :  { %v449_v41 = vadd.f32 %v3711_v38, %v448_v40  ;;  %v2512_v42 = vpop.f32.mrb[1].mxu0  ;;  %v2518_v43 = vpop.f32.mrb[1].mxu1  ;;  %v397_v53 = vadd.f32 %v3714_v49, %v396_v39  ;;  %v796_v40 = vsel %vm358_vm1, %v785_v34, 0 }
 0x394   :  { %v399_v44 = vpop.f32.mrb[2].mxu0  ;;  %v451_v45 = vpop.f32.mrb[2].mxu1 }
 0x395   :  { %v509_v46 = vpack.c.bf16 %v449_v41, %v449_v41  ;;  %v2513_v47 = vpop.f32.mrb[3].mxu0  ;;  %v2519_v48 = vpop.f32.mrb[3].mxu1  ;;  %v452_v51 = vadd.f32 %v3711_v38, %v451_v45  ;;  %v507_v59 = vpack.c.bf16 %v397_v53, %v397_v53  ;;  %v400_v1 = vadd.f32 %v3714_v49, %v399_v44 }
 0x396   :  { %v851_v41 = vsel %vm358_vm1, %v840_v35, 0 }
 0x397   :  { %v517_v50 = vsel %vm354_vm3, %v509_v46, 0  ;;  %v510_v55 = vpack.c.bf16 %v452_v51, %v452_v51  ;;  %v508_v3 = vpack.c.bf16 %v400_v1, %v400_v1 }
 0x398   :  { %2527 = vmatpush3.bf16.xpose.msra.mxu0 %v517_v50 }
 0x399   :  { %2532 = vmatprep.subr.bf16.mxu0 %v3298_v16  ;;  %v563_v62 = vsel %vm354_vm3, %v510_v55, 0 }
 0x39a   :  { %v500_v54 = vpop.f32.mrb[4].mxu0 }
 0x39b   :  { %v501_v56 = vadd.f32 %v3718_v52, %v500_v54  ;;  %v2524_v57 = vpop.f32.mrb[5].mxu0 }
 0x39c   :  { %v503_v58 = vpop.f32.mrb[6].mxu0 }
 0x39d   :  { %v511_v60 = vpack.c.bf16 %v501_v56, %v501_v56  ;;  %v2525_v61 = vpop.f32.mrb[7].mxu0  ;;  %v504_v0 = vadd.f32 %v3718_v52, %v503_v58 }
 0x39f   :  { %v633_v63 = vsel %vm358_vm1, %v511_v60, 0  ;;  %2529 = vmatmul.mubr.msk.bf16.vlgmr.msra.gmra.mrb[8].mxu0 %vm354_vm3, %v507_v59  ;;  %v512_v2 = vpack.c.bf16 %v504_v0, %v504_v0 }
 0x3a0   :  { %2533 = vmatpush3.bf16.xpose.msra.mxu0 %v563_v62  ;;  %2539 = vmatpush3.bf16.msra.mxu1 %v633_v63 }
 0x3a1   :  { %2534 = vmatprep.mubr.msk.bf16.mxu0 %vm3299_vm2, %v3298_v16  ;;  %2544 = vmatprep.subr.bf16.mxu0 %v3298_v16  ;;  %v679_v4 = vsel %vm358_vm1, %v512_v2, 0 }
 0x3a2   :  { %2550 = vmatprep.subr.bf16.mxu1 %v3298_v16 }
 0x3a7   :  { %2535 = vmatmul.mubr.msk.bf16.vlgmr.msra.gmra.mrb[12].mxu0 %vm354_vm3, %v508_v3 }
 0x3a8   :  { %2545 = vmatpush3.bf16.msra.mxu0 %v679_v4  ;;  %2546 = vmatprep.mubr.msk.bf16.mxu0 %vm3299_vm2, %v3298_v16 }
 0x3a9   :  { %2556 = vmatprep.subr.bf16.mxu0 %v3298_v16 }
 0x472   :  { %v553_v5 = vpop.f32.mrb[8].mxu0 }
 0x473   :  { %v2530_v6 = vpop.f32.mrb[9].mxu0  ;;  %v605_v7 = vsel %vm354_vm3, %v553_v5, -inf }
 0x474   :  { %606 = vmax.xlane.f32.xlu1 %v605_v7  ;;  %v556_v8 = vpop.f32.mrb[10].mxu0 }
 0x475   :  { %v2531_v9 = vpop.f32.mrb[11].mxu0 }
 0x47a   :  { %v599_v10 = vpop.f32.mrb[12].mxu0 }
 0x47b   :  { %v2536_v11 = vpop.f32.mrb[13].mxu0  ;;  %v608_v12 = vsel %vm354_vm3, %v599_v10, -inf }
 0x47c   :  { %609 = vmax.xlane.f32.xlu0 %v608_v12  ;;  %v602_v13 = vpop.f32.mrb[14].mxu0 }
 0x47d   :  { %v2537_v14 = vpop.f32.mrb[15].mxu0 }
 0x501   :  { %v607_v15 = vpop.xlane.xlu1 %606 }
 0x502   :  { %v611_v17 = vsub.f32 %v553_v5, %v607_v15 }
 0x504   :  { %v613_v18 = vmul.f32 1.442695, %v611_v17 }
 0x506   :  { %2771 = vpow2.f32 %v613_v18 }
 0x509   :  { %v610_v19 = vpop.xlane.xlu0 %609 }
 0x50a   :  { %v612_v20 = vsub.f32 %v599_v10, %v610_v19 }
 0x50c   :  { %v615_v21 = vmul.f32 1.442695, %v612_v20 }
 0x50e   :  { %2773 = vpow2.f32 %v615_v21 }
 0x510   :  { %v2772_v22 = vpop.eup %2771 }
 0x511   :  { %v617_v23 = vsel %vm354_vm3, %v2772_v22, 0.0 }
 0x512   :  { %618 = vadd.xlane.f32.xlu1 %v617_v23 }
 0x518   :  { %v2774_v24 = vpop.eup %2773 }
 0x519   :  { %v620_v25 = vsel %vm354_vm3, %v2774_v24, 0.0 }
 0x51a   :  { %621 = vadd.xlane.f32.xlu0 %v620_v25 }
 0x523   :  { %792 = vrot.lane.b32.xlu1 %v3711_v38, %s3300_s12 }
 0x527   :  { %734 = vrot.lane.b32.xlu1 %v3714_v49, %s3300_s12 }
 0x530   :  { %732 = vrot.lane.b32.xlu0 %v3695_v36, %s3300_s12 }
 0x59f   :  { %v619_v26 = vpop.xlane.xlu1 %618 }
 0x5a0   :  { %2775 = vrcp.f32 %v619_v26 }
 0x5a3   :  { %v793_v58 = vpop.permute.xlu1 %792 }
 0x5a7   :  { %v622_v27 = vpop.xlane.xlu0 %621  ;;  %v735_v6 = vpop.permute.xlu1 %734 }
 0x5a8   :  { %2777 = vrcp.f32 %v622_v27 }
 0x5aa   :  { %v2776_v28 = vpop.eup %2775 }
 0x5ab   :  { %v625_v30 = vmul.f32 %v2776_v28, %v2772_v22  ;;  %v733_v42 = vpop.permute.xlu0 %732 }
 0x5ad   :  { %v627_v31 = vpack.c.bf16 %v625_v30, %v625_v30 }
 0x5af   :  { %2541 = vmatmul.mubr.msk.bf16.vlgmr.msra.gmra.mrb[4].mxu1 %vm354_vm3, %v627_v31 }
 0x5b0   :  { %2551 = vmatpush3.bf16.msra.mxu1 %v741_v32  ;;  %2552 = vmatprep.mubr.msk.bf16.mxu1 %vm3299_vm2, %v3298_v16 }
 0x5b1   :  { %2562 = vmatprep.subr.bf16.mxu1 %v3298_v16 }
 0x5b2   :  { %v2778_v33 = vpop.eup %2777 }
 0x5b3   :  { %v626_v37 = vmul.f32 %v2778_v33, %v2774_v24 }
 0x5b5   :  { %v628_v39 = vpack.c.bf16 %v626_v37, %v626_v37 }
 0x5b7   :  { %2547 = vmatmul.mubr.msk.bf16.vlgmr.msra.gmra.mrb[16].mxu0 %vm354_vm3, %v628_v39  ;;  %2553 = vmatmul.mubr.msk.bf16.vlgmr.msra.gmra.mrb[8].mxu1 %vm354_vm3, %v733_v42 }
 0x5b8   :  { %2557 = vmatpush3.bf16.msra.mxu0 %v796_v40  ;;  %2563 = vmatpush3.bf16.msra.mxu1 %v851_v41 }
 0x5b9   :  { %2558 = vmatprep.mubr.msk.bf16.mxu0 %vm3299_vm2, %v3298_v16  ;;  %2564 = vmatprep.mubr.msk.bf16.mxu1 %vm3299_vm2, %v3298_v16 }
 0x5ba   :  { %2568 = vmatprep.subr.bf16.mxu0 %v3298_v16  ;;  %2574 = vmatprep.subr.bf16.mxu1 %v3298_v16 }
 0x5bf   :  { %2559 = vmatmul.mubr.msk.bf16.vlgmr.msra.gmra.mrb[20].mxu0 %vm354_vm3, %v733_v42  ;;  %2565 = vmatmul.mubr.msk.bf16.vlgmr.msra.gmra.mrb[12].mxu1 %vm354_vm3, %v733_v42 }
 0x5c0   :  { %2570 = vmatprep.mubr.msk.bf16.mxu0 %vm3299_vm2, %v3298_v16  ;;  %2576 = vmatprep.mubr.msk.bf16.mxu1 %vm3299_vm2, %v3298_v16 }
 0x682   :  { %v3768_v43 = vpop.f32.mrb[4].mxu1 }
 0x683   :  { %v2542_v44 = vpop.f32.mrb[5].mxu1 }
 0x684   :  { %v672_v45 = vpop.f32.mrb[6].mxu1 }
 0x685   :  { %v2543_v46 = vpop.f32.mrb[7].mxu1 }
 0x68a   :  { %v3770_v47 = vpop.f32.mrb[16].mxu0  ;;  %v777_v48 = vpop.f32.mrb[8].mxu1 }
 0x68b   :  { %v721_v50 = vpack.c.bf16 %v3770_v47, %v3768_v43  ;;  %v2548_v51 = vpop.f32.mrb[17].mxu0  ;;  %v2554_v53 = vpop.f32.mrb[9].mxu1  ;;  %v778_v9 = vadd.f32 %v777_v48, %v735_v6 }
 0x68c   :  { %v718_v54 = vpop.f32.mrb[18].mxu0  ;;  %v780_v55 = vpop.f32.mrb[10].mxu1 }
 0x68d   :  { %v2549_v56 = vpop.f32.mrb[19].mxu0  ;;  %v2555_v57 = vpop.f32.mrb[11].mxu1  ;;  %v781_v11 = vadd.f32 %v780_v55, %v735_v6  ;;  %v894_v12 = vpack.c.bf16 %v778_v9, %v778_v9  ;;  %v722_v55 = vld [vmem:[#allocation17] sm:$0xf] }
 0x68f   :  { %v895_v13 = vpack.c.bf16 %v781_v11, %v781_v11 }
 0x692   :  { %v832_v59 = vpop.f32.mrb[20].mxu0  ;;  %v887_v60 = vpop.f32.mrb[12].mxu1 }
 0x693   :  { %v833_v61 = vadd.f32 %v832_v59, %v793_v58  ;;  %v2560_v62 = vpop.f32.mrb[21].mxu0  ;;  %v2566_v63 = vpop.f32.mrb[13].mxu1  ;;  %v1265_v59 = vld [vmem:[#allocation11 + $0x8] sm:$0xf] }
 0x694   :  { %v835_v0 = vpop.f32.mrb[22].mxu0  ;;  %v890_v1 = vpop.f32.mrb[14].mxu1  ;;  %v1109_v62 = vld [vmem:[#allocation17 + $0x4] sm:$0xf] }
 0x695   :  { %v896_v2 = vpack.c.bf16 %v833_v61, %v833_v61  ;;  %v836_v3 = vadd.f32 %v835_v0, %v793_v58  ;;  %v2561_v4 = vpop.f32.mrb[23].mxu0  ;;  %v2567_v5 = vpop.f32.mrb[15].mxu1  ;;  %v1161_v58 = vsel %vm358_vm1, %v722_v55, 0  ;;  %v1114_v63 = vsel %vm358_vm1, %v1109_v62, 0  ;;  %v1205_v0 = vld [vmem:[#allocation8 + $0x8] sm:$0xf] }
 0x696   :  { %v1221_v5 = vsel %vm358_vm1, %v1205_v0, 0 }
 0x697   :  { %v904_v7 = vsel %vm354_vm3, %v896_v2, 0  ;;  %v897_v8 = vpack.c.bf16 %v836_v3, %v836_v3 }
 0x698   :  { %2569 = vmatpush3.bf16.xpose.msra.mxu0 %v904_v7 }
 0x699   :  { %v950_v10 = vsel %vm354_vm3, %v897_v8, 0  ;;  %2580 = vmatprep.subr.bf16.mxu0 %v3298_v16  ;;  %v1320_v8 = vld [vmem:[#allocation14 + $0x8] sm:$0xf] }
 0x69a   :  { %2575 = vmatpush3.bf16.xpose.msra.mxu1 %v950_v10  ;;  %v1331_v11 = vsel %vm358_vm1, %v1320_v8, 0 }
 0x69b   :  { %2586 = vmatprep.subr.bf16.mxu1 %v3298_v16 }
 0x69f   :  { %2571 = vmatmul.mubr.msk.bf16.vlgmr.msra.gmra.mrb[24].mxu0 %vm354_vm3, %v894_v12 }
 0x6a0   :  { %2582 = vmatprep.mubr.msk.bf16.mxu0 %vm3299_vm2, %v3298_v16 }
 0x6a1   :  { %2577 = vmatmul.mubr.msk.bf16.vlgmr.msra.gmra.mrb[16].mxu1 %vm354_vm3, %v895_v13 }
 0x6a2   :  { %2588 = vmatprep.mubr.msk.bf16.mxu1 %vm3299_vm2, %v3298_v16 }
 0x772   :  { %v940_v14 = vpop.f32.mrb[24].mxu0 }
 0x773   :  { %v2572_v15 = vpop.f32.mrb[25].mxu0  ;;  %v992_v17 = vsel %vm354_vm3, %v940_v14, -inf }
 0x774   :  { %v986_v18 = vpop.f32.mrb[16].mxu1  ;;  %993 = vmax.xlane.f32.xlu1 %v992_v17  ;;  %v943_v19 = vpop.f32.mrb[26].mxu0 }
 0x775   :  { %v2573_v20 = vpop.f32.mrb[27].mxu0  ;;  %v2578_v21 = vpop.f32.mrb[17].mxu1  ;;  %v995_v22 = vsel %vm354_vm3, %v986_v18, -inf }
 0x776   :  { %996 = vmax.xlane.f32.xlu0 %v995_v22  ;;  %v989_v23 = vpop.f32.mrb[18].mxu1 }
 0x777   :  { %v2579_v24 = vpop.f32.mrb[19].mxu1 }
 0x785   :  { %847 = vrot.lane.b32.xlu1 %v3718_v52, %s3300_s12 }
 0x789   :  { %1272 = vrot.lane.b32.xlu1 %v3711_v38, %s3301_s20 }
 0x78d   :  { %1214 = vrot.lane.b32.xlu1 %v3714_v49, %s3301_s20 }
 0x801   :  { %v994_v25 = vpop.xlane.xlu1 %993 }
 0x802   :  { %v998_v26 = vsub.f32 %v940_v14, %v994_v25 }
 0x803   :  { %v997_v27 = vpop.xlane.xlu0 %996 }
 0x804   :  { %v1000_v28 = vmul.f32 1.442695, %v998_v26  ;;  %v999_v29 = vsub.f32 %v986_v18, %v997_v27 }
 0x805   :  { %v848_v30 = vpop.permute.xlu1 %847 }
 0x806   :  { %2779 = vpow2.f32 %v1000_v28  ;;  %v1002_v31 = vmul.f32 1.442695, %v999_v29  ;;  %v888_v32 = vadd.f32 %v887_v60, %v848_v30  ;;  %v891_v33 = vadd.f32 %v890_v1, %v848_v30 }
 0x807   :  { %v1276_v60 = vsel %vm358_vm1, %v1265_v59, 0 }
 0x808   :  { %2781 = vpow2.f32 %v1002_v31  ;;  %v898_v34 = vpack.c.bf16 %v888_v32, %v888_v32  ;;  %v899_v35 = vpack.c.bf16 %v891_v33, %v891_v33 }
 0x809   :  { %v1273_v14 = vpop.permute.xlu1 %1272 }
 0x80a   :  { %v1020_v37 = vsel %vm358_vm1, %v898_v34, 0  ;;  %v1066_v39 = vsel %vm358_vm1, %v899_v35, 0 }
 0x80b   :  { %2581 = vmatpush3.bf16.msra.mxu0 %v1020_v37  ;;  %2587 = vmatpush3.bf16.msra.mxu1 %v1066_v39 }
 0x80c   :  { %2598 = vmatprep.subr.bf16.mxu1 %v3298_v16  ;;  %2592 = vmatprep.subr.bf16.mxu0 %v3298_v16 }
 0x80d   :  { %v1215_v32 = vpop.permute.xlu1 %1214 }
 0x810   :  { %v2780_v40 = vpop.eup %2779 }
 0x811   :  { %v1004_v41 = vsel %vm354_vm3, %v2780_v40, 0.0 }
 0x812   :  { %v2782_v42 = vpop.eup %2781  ;;  %1005 = vadd.xlane.f32.xlu0 %v1004_v41 }
 0x813   :  { %v1007_v44 = vsel %vm354_vm3, %v2782_v42, 0.0 }
 0x816   :  { %1008 = vadd.xlane.f32.xlu0 %v1007_v44 }
 0x82c   :  { %1212 = vrot.lane.b32.xlu0 %v3695_v36, %s3301_s20 }
 0x89f   :  { %v1006_v45 = vpop.xlane.xlu0 %1005 }
 0x8a0   :  { %2783 = vrcp.f32 %v1006_v45 }
 0x8a3   :  { %v1009_v46 = vpop.xlane.xlu0 %1008 }
 0x8a4   :  { %2785 = vrcp.f32 %v1009_v46 }
 0x8a7   :  { %v1213_v61 = vpop.permute.xlu0 %1212 }
 0x8aa   :  { %v2784_v48 = vpop.eup %2783 }
 0x8ab   :  { %v1012_v51 = vmul.f32 %v2784_v48, %v2780_v40 }
 0x8ad   :  { %v1014_v53 = vpack.c.bf16 %v1012_v51, %v1012_v51 }
 0x8ae   :  { %v2786_v54 = vpop.eup %2785 }
 0x8af   :  { %v1013_v56 = vmul.f32 %v2786_v54, %v2782_v42  ;;  %2583 = vmatmul.mubr.msk.bf16.vlgmr.msra.gmra.mrb[28].mxu0 %vm354_vm3, %v1014_v53 }
 0x8b0   :  { %2594 = vmatprep.mubr.msk.bf16.mxu0 %vm3299_vm2, %v3298_v16  ;;  %2593 = vmatpush3.bf16.msra.mxu0 %v1114_v63 }
 0x8b1   :  { %v1015_v57 = vpack.c.bf16 %v1013_v56, %v1013_v56  ;;  %2604 = vmatprep.subr.bf16.mxu0 %v3298_v16 }
 0x8b3   :  { %2589 = vmatmul.mubr.msk.bf16.vlgmr.msra.gmra.mrb[20].mxu1 %vm354_vm3, %v1015_v57 }
 0x8b4   :  { %2599 = vmatpush3.bf16.msra.mxu1 %v1161_v58  ;;  %2600 = vmatprep.mubr.msk.bf16.mxu1 %vm3299_vm2, %v3298_v16 }
 0x8b5   :  { %2610 = vmatprep.subr.bf16.mxu1 %v3298_v16 }
 0x8bb   :  { %2601 = vmatmul.mubr.msk.bf16.vlgmr.msra.gmra.mrb[24].mxu1 %vm354_vm3, %v721_v50 }
 0x8bc   :  { %2611 = vmatpush3.bf16.msra.mxu1 %v1276_v60  ;;  %2612 = vmatprep.mubr.msk.bf16.mxu1 %vm3299_vm2, %v3298_v16 }
 0x8bd   :  { %2622 = vmatprep.subr.bf16.mxu1 %v3298_v16 }
 0x8c3   :  { %2613 = vmatmul.mubr.msk.bf16.vlgmr.msra.gmra.mrb[28].mxu1 %vm354_vm3, %v1213_v61 }
 0x8c4   :  { %2624 = vmatprep.mubr.msk.bf16.mxu1 %vm3299_vm2, %v3298_v16 }
 0x982   :  { %v1056_v43 = vpop.f32.mrb[28].mxu0 }
 0x983   :  { %v2584_v47 = vpop.f32.mrb[29].mxu0 }
 0x984   :  { %v1059_v50 = vpop.f32.mrb[30].mxu0 }
 0x985   :  { %v2585_v1 = vpop.f32.mrb[31].mxu0 }
 0x986   :  { %v1102_v2 = vpop.f32.mrb[20].mxu1 }
 0x987   :  { %v1108_v3 = vpack.c.bf16 %v1102_v2, %v1056_v43  ;;  %v2590_v4 = vpop.f32.mrb[21].mxu1 }
 0x988   :  { %v1105_v6 = vpop.f32.mrb[22].mxu1 }
 0x989   :  { %v2591_v7 = vpop.f32.mrb[23].mxu1  ;;  %2595 = vmatmul.mubr.msk.bf16.vlgmr.msra.gmra.mrb[32].mxu0 %vm354_vm3, %v1108_v3 }
 0x98a   :  { %2605 = vmatpush3.bf16.msra.mxu0 %v1221_v5  ;;  %2606 = vmatprep.mubr.msk.bf16.mxu0 %vm3299_vm2, %v3298_v16 }
 0x98b   :  { %2616 = vmatprep.subr.bf16.mxu0 %v3298_v16 }
 0x98e   :  { %v1197_v9 = vpop.f32.mrb[24].mxu1 }
 0x98f   :  { %v2602_v10 = vpop.f32.mrb[25].mxu1 }
 0x990   :  { %v1200_v12 = vpop.f32.mrb[26].mxu1 }
 0x991   :  { %v2603_v13 = vpop.f32.mrb[27].mxu1  ;;  %2607 = vmatmul.mubr.msk.bf16.vlgmr.msra.gmra.mrb[36].mxu0 %vm354_vm3, %v1213_v61 }
 0x992   :  { %2617 = vmatpush3.bf16.msra.mxu0 %v1331_v11  ;;  %2618 = vmatprep.mubr.msk.bf16.mxu0 %vm3299_vm2, %v3298_v16 }
 0x993   :  { %2628 = vmatprep.subr.bf16.mxu0 %v3298_v16 }
 0x996   :  { %v1312_v15 = vpop.f32.mrb[28].mxu1 }
 0x997   :  { %v1313_v17 = vadd.f32 %v1312_v15, %v1273_v14  ;;  %v2614_v18 = vpop.f32.mrb[29].mxu1 }
 0x998   :  { %v1315_v19 = vpop.f32.mrb[30].mxu1 }
 0x999   :  { %v1376_v20 = vpack.c.bf16 %v1313_v17, %v1313_v17  ;;  %v1316_v21 = vadd.f32 %v1315_v19, %v1273_v14  ;;  %v2615_v22 = vpop.f32.mrb[31].mxu1  ;;  %2619 = vmatmul.mubr.msk.bf16.vlgmr.msra.gmra.mrb[40].mxu0 %vm354_vm3, %v1213_v61  ;;  %v1640_v17 = vld [vmem:[#allocation8 + $0xc] sm:$0xf] }
 0x99a   :  { %2630 = vmatprep.mubr.msk.bf16.mxu0 %vm3299_vm2, %v3298_v16 }
 0x99b   :  { %v1377_v23 = vpack.c.bf16 %v1316_v21, %v1316_v21  ;;  %v1384_v24 = vsel %vm354_vm3, %v1376_v20, 0  ;;  %v1656_v20 = vsel %vm358_vm1, %v1640_v17, 0 }
 0x99c   :  { %2623 = vmatpush3.bf16.xpose.msra.mxu1 %v1384_v24 }
 0x99d   :  { %v1430_v25 = vsel %vm354_vm3, %v1377_v23, 0  ;;  %2634 = vmatprep.subr.bf16.mxu1 %v3298_v16  ;;  %v1589_v23 = vld [vmem:[#allocation17 + $0x8] sm:$0xf] }
 0x99e   :  { %2629 = vmatpush3.bf16.xpose.msra.mxu0 %v1430_v25  ;;  %v1594_v24 = vsel %vm358_vm1, %v1589_v23, 0 }
 0x99f   :  { %2640 = vmatprep.subr.bf16.mxu0 %v3298_v16 }
 0xa5c   :  { %v1150_v26 = vpop.f32.mrb[32].mxu0 }
 0xa5d   :  { %v3838_v27 = vadd.f32 %v1197_v9, %v1150_v26  ;;  %v2596_v28 = vpop.f32.mrb[33].mxu0 }
 0xa5e   :  { %v1153_v29 = vpop.f32.mrb[34].mxu0 }
 0xa5f   :  { %v3840_v30 = vadd.f32 %v1200_v12, %v1153_v29  ;;  %v2597_v31 = vpop.f32.mrb[35].mxu0  ;;  %v1700_v29 = vld [vmem:[#allocation11 + $0xc] sm:$0xf] }
 0xa64   :  { %v1257_v33 = vpop.f32.mrb[36].mxu0 }
 0xa65   :  { %v1258_v34 = vadd.f32 %v1257_v33, %v1215_v32  ;;  %v2608_v35 = vpop.f32.mrb[37].mxu0 }
 0xa66   :  { %v1260_v37 = vpop.f32.mrb[38].mxu0  ;;  %v1711_v35 = vsel %vm358_vm1, %v1700_v29, 0 }
 0xa67   :  { %v1374_v39 = vpack.c.bf16 %v1258_v34, %v1258_v34  ;;  %v1261_v40 = vadd.f32 %v1260_v37, %v1215_v32  ;;  %v2609_v41 = vpop.f32.mrb[39].mxu0 }
 0xa69   :  { %v1375_v42 = vpack.c.bf16 %v1261_v40, %v1261_v40  ;;  %2625 = vmatmul.mubr.msk.bf16.vlgmr.msra.gmra.mrb[32].mxu1 %vm354_vm3, %v1374_v39 }
 0xa6a   :  { %2636 = vmatprep.mubr.msk.bf16.mxu1 %vm3299_vm2, %v3298_v16 }
 0xa6b   :  { %2631 = vmatmul.mubr.msk.bf16.vlgmr.msra.gmra.mrb[44].mxu0 %vm354_vm3, %v1375_v42 }
 0xa6c   :  { %v1367_v44 = vpop.f32.mrb[40].mxu0  ;;  %2642 = vmatprep.mubr.msk.bf16.mxu0 %vm3299_vm2, %v3298_v16 }
 0xa6d   :  { %v2620_v45 = vpop.f32.mrb[41].mxu0 }
 0xa6e   :  { %v1370_v46 = vpop.f32.mrb[42].mxu0 }
 0xa6f   :  { %v2621_v48 = vpop.f32.mrb[43].mxu0 }
 0xb3c   :  { %v1420_v51 = vpop.f32.mrb[32].mxu1 }
 0xb3d   :  { %v2626_v53 = vpop.f32.mrb[33].mxu1  ;;  %v1472_v54 = vsel %vm354_vm3, %v1420_v51, -inf }
 0xb3e   :  { %1473 = vmax.xlane.f32.xlu1 %v1472_v54  ;;  %v1423_v55 = vpop.f32.mrb[34].mxu1  ;;  %v1466_v56 = vpop.f32.mrb[44].mxu0 }
 0xb3f   :  { %v2627_v57 = vpop.f32.mrb[35].mxu1  ;;  %v2632_v58 = vpop.f32.mrb[45].mxu0  ;;  %v1475_v59 = vsel %vm354_vm3, %v1466_v56, -inf }
 0xb40   :  { %1476 = vmax.xlane.f32.xlu0 %v1475_v59  ;;  %v1469_v60 = vpop.f32.mrb[46].mxu0 }
 0xb41   :  { %v2633_v61 = vpop.f32.mrb[47].mxu0 }
 0xb4f   :  { %1327 = vrot.lane.b32.xlu1 %v3718_v52, %s3301_s20 }
 0xb53   :  { %1707 = vrot.lane.b32.xlu1 %v3711_v38, %s3302_s7 }
 0xb57   :  { %1649 = vrot.lane.b32.xlu1 %v3714_v49, %s3302_s7 }
 0xbcb   :  { %v1474_v62 = vpop.xlane.xlu1 %1473 }
 0xbcc   :  { %v1478_v63 = vsub.f32 %v1420_v51, %v1474_v62 }
 0xbcd   :  { %v1477_v43 = vpop.xlane.xlu0 %1476 }
 0xbce   :  { %v1480_v47 = vmul.f32 1.442695, %v1478_v63  ;;  %v1479_v50 = vsub.f32 %v1466_v56, %v1477_v43 }
 0xbcf   :  { %v1328_v0 = vpop.permute.xlu1 %1327 }
 0xbd0   :  { %2787 = vpow2.f32 %v1480_v47  ;;  %v1482_v1 = vmul.f32 1.442695, %v1479_v50  ;;  %v1368_v2 = vadd.f32 %v1367_v44, %v1328_v0  ;;  %v1371_v3 = vadd.f32 %v1370_v46, %v1328_v0 }
 0xbd2   :  { %2789 = vpow2.f32 %v1482_v1  ;;  %v1378_v4 = vpack.c.bf16 %v1368_v2, %v1368_v2  ;;  %v1379_v5 = vpack.c.bf16 %v1371_v3, %v1371_v3 }
 0xbd3   :  { %v1708_v59 = vpop.permute.xlu1 %1707 }
 0xbd4   :  { %v1500_v6 = vsel %vm358_vm1, %v1378_v4, 0  ;;  %v1546_v38 = vsel %vm358_vm1, %v1379_v5, 0 }
 0xbd5   :  { %2635 = vmatpush3.bf16.msra.mxu1 %v1500_v6  ;;  %2641 = vmatpush3.bf16.msra.mxu0 %v1546_v38 }
 0xbd6   :  { %2652 = vmatprep.subr.bf16.mxu0 %v3298_v16  ;;  %2646 = vmatprep.subr.bf16.mxu1 %v3298_v16 }
 0xbd7   :  { %v1650_v0 = vpop.permute.xlu1 %1649 }
 0xbda   :  { %v2788_v49 = vpop.eup %2787 }
 0xbdb   :  { %v1484_v7 = vsel %vm354_vm3, %v2788_v49, 0.0 }
 0xbdc   :  { %v2790_v8 = vpop.eup %2789  ;;  %1485 = vadd.xlane.f32.xlu0 %v1484_v7 }
 0xbdd   :  { %v1487_v9 = vsel %vm354_vm3, %v2790_v8, 0.0 }
 0xbe0   :  { %1488 = vadd.xlane.f32.xlu0 %v1487_v9 }
 0xbf6   :  { %1647 = vrot.lane.b32.xlu0 %v3695_v36, %s3302_s7  ;;  %v1755_v36 = vld [vmem:[#allocation14 + $0xc] sm:$0xf] }
 0xbf7   :  { %v1766_v21 = vsel %vm358_vm1, %v1755_v36, 0 }
 0xc69   :  { %v1486_v10 = vpop.xlane.xlu0 %1485 }
 0xc6a   :  { %2791 = vrcp.f32 %v1486_v10 }
 0xc6d   :  { %v1489_v11 = vpop.xlane.xlu0 %1488 }
 0xc6e   :  { %2793 = vrcp.f32 %v1489_v11 }
 0xc71   :  { %v1648_v22 = vpop.permute.xlu0 %1647 }
 0xc74   :  { %v2792_v12 = vpop.eup %2791 }
 0xc75   :  { %v1492_v13 = vmul.f32 %v2792_v12, %v2788_v49 }
 0xc77   :  { %v1494_v14 = vpack.c.bf16 %v1492_v13, %v1492_v13 }
 0xc78   :  { %v2794_v15 = vpop.eup %2793 }
 0xc79   :  { %v1493_v18 = vmul.f32 %v2794_v15, %v2790_v8  ;;  %2637 = vmatmul.mubr.msk.bf16.vlgmr.msra.gmra.mrb[36].mxu1 %vm354_vm3, %v1494_v14 }
 0xc7a   :  { %2648 = vmatprep.mubr.msk.bf16.mxu1 %vm3299_vm2, %v3298_v16  ;;  %2647 = vmatpush3.bf16.msra.mxu1 %v1594_v24 }
 0xc7b   :  { %v1495_v19 = vpack.c.bf16 %v1493_v18, %v1493_v18  ;;  %2658 = vmatprep.subr.bf16.mxu1 %v3298_v16 }
 0xc7d   :  { %2643 = vmatmul.mubr.msk.bf16.vlgmr.msra.gmra.mrb[48].mxu0 %vm354_vm3, %v1495_v19 }
 0xc7e   :  { %2653 = vmatpush3.bf16.msra.mxu0 %v1656_v20  ;;  %2654 = vmatprep.mubr.msk.bf16.mxu0 %vm3299_vm2, %v3298_v16 }
 0xc7f   :  { %2664 = vmatprep.subr.bf16.mxu0 %v3298_v16 }
 0xc85   :  { %2655 = vmatmul.mubr.msk.bf16.vlgmr.msra.gmra.mrb[52].mxu0 %vm354_vm3, %v1648_v22 }
 0xc86   :  { %2665 = vmatpush3.bf16.msra.mxu0 %v1766_v21  ;;  %2666 = vmatprep.mubr.msk.bf16.mxu0 %vm3299_vm2, %v3298_v16 }
 0xc87   :  { %2676 = vmatprep.subr.bf16.mxu0 %v3298_v16 }
 0xc8d   :  { %2667 = vmatmul.mubr.msk.bf16.vlgmr.msra.gmra.mrb[56].mxu0 %vm354_vm3, %v1648_v22 }
 0xc8e   :  { %2678 = vmatprep.mubr.msk.bf16.mxu0 %vm3299_vm2, %v3298_v16 }
 0xd4c   :  { %v1536_v25 = vpop.f32.mrb[36].mxu1 }
 0xd4d   :  { %v2638_v26 = vpop.f32.mrb[37].mxu1 }
 0xd4e   :  { %v1539_v28 = vpop.f32.mrb[38].mxu1 }
 0xd4f   :  { %v2639_v31 = vpop.f32.mrb[39].mxu1 }
 0xd50   :  { %v1582_v32 = vpop.f32.mrb[48].mxu0 }
 0xd51   :  { %v1588_v33 = vpack.c.bf16 %v1582_v32, %v1536_v25  ;;  %v2644_v34 = vpop.f32.mrb[49].mxu0 }
 0xd52   :  { %v1585_v37 = vpop.f32.mrb[50].mxu0 }
 0xd53   :  { %v2645_v39 = vpop.f32.mrb[51].mxu0  ;;  %2649 = vmatmul.mubr.msk.bf16.vlgmr.msra.gmra.mrb[40].mxu1 %vm354_vm3, %v1588_v33 }
 0xd54   :  { %2659 = vmatpush3.bf16.msra.mxu1 %v1711_v35  ;;  %2660 = vmatprep.mubr.msk.bf16.mxu1 %vm3299_vm2, %v3298_v16 }
 0xd55   :  { %2670 = vmatprep.subr.bf16.mxu1 %v3298_v16 }
 0xd58   :  { %v1692_v40 = vpop.f32.mrb[52].mxu0 }
 0xd59   :  { %v2656_v41 = vpop.f32.mrb[53].mxu0 }
 0xd5a   :  { %v1695_v42 = vpop.f32.mrb[54].mxu0 }
 0xd5b   :  { %v2657_v44 = vpop.f32.mrb[55].mxu0  ;;  %2661 = vmatmul.mubr.msk.bf16.vlgmr.msra.gmra.mrb[44].mxu1 %vm354_vm3, %v1648_v22 }
 0xd5c   :  { %2672 = vmatprep.mubr.msk.bf16.mxu1 %vm3299_vm2, %v3298_v16 }
 0xd60   :  { %v1802_v45 = vpop.f32.mrb[56].mxu0 }
 0xd61   :  { %v2668_v46 = vpop.f32.mrb[57].mxu0 }
 0xd62   :  { %v1805_v48 = vpop.f32.mrb[58].mxu0 }
 0xd63   :  { %v2669_v51 = vpop.f32.mrb[59].mxu0 }
 0xe26   :  { %v1630_v53 = vpop.f32.mrb[40].mxu1 }
 0xe27   :  { %v3891_v54 = vadd.f32 %v1630_v53, %v3838_v27  ;;  %v2650_v55 = vpop.f32.mrb[41].mxu1  ;;  %v1693_v27 = vadd.f32 %v1692_v40, %v1650_v0 }
 0xe28   :  { %v1633_v56 = vpop.f32.mrb[42].mxu1 }
 0xe29   :  { %v3894_v57 = vadd.f32 %v1633_v56, %v3840_v30  ;;  %v2651_v58 = vpop.f32.mrb[43].mxu1  ;;  %v1696_v30 = vadd.f32 %v1695_v42, %v1650_v0  ;;  %v1809_v4 = vpack.c.bf16 %v1693_v27, %v1693_v27  ;;  %v2024_v42 = vld [vmem:[#allocation17 + $0xc] sm:$0xf] }
 0xe2a   :  { %v2029_v44 = vsel %vm358_vm1, %v2024_v42, 0  ;;  %v2764_v42 = vld [vmem:[#allocation26 + $0x28] sm:$0xff]  }
 0xe2b   :  { %v1810_v5 = vpack.c.bf16 %v1696_v30, %v1696_v30  ;;  %v2811_v30 = vld [vmem:[#allocation2] sm:$0xff] }
 0xe2e   :  { %v1747_v60 = vpop.f32.mrb[44].mxu1 }
 0xe2f   :  { %v1748_v61 = vadd.f32 %v1747_v60, %v1708_v59  ;;  %v2662_v62 = vpop.f32.mrb[45].mxu1 }
 0xe30   :  { %v1750_v63 = vpop.f32.mrb[46].mxu1 }
 0xe31   :  { %v1811_v43 = vpack.c.bf16 %v1748_v61, %v1748_v61  ;;  %v1751_v47 = vadd.f32 %v1750_v63, %v1708_v59  ;;  %v2663_v50 = vpop.f32.mrb[47].mxu1  ;;  %v2414_v61 = vld [vmem:[#allocation19] ss:$0 sm:$0xff] }
 0xe33   :  { %v1819_v1 = vsel %vm354_vm3, %v1811_v43, 0  ;;  %v1812_v2 = vpack.c.bf16 %v1751_v47, %v1751_v47  ;;  %v2415_v43 = vld [vmem:[#allocation29] ss:$0 sm:$0xff] }
 0xe34   :  { %2671 = vmatpush3.bf16.xpose.msra.mxu1 %v1819_v1 }
 0xe35   :  { %v1865_v3 = vsel %vm354_vm3, %v1812_v2, 0  ;;  %2682 = vmatprep.subr.bf16.mxu1 %v3298_v16 }
 0xe36   :  { %2677 = vmatpush3.bf16.xpose.msra.mxu0 %v1865_v3 }
 0xe37   :  { %2688 = vmatprep.subr.bf16.mxu0 %v3298_v16 }
 0xe3b   :  { %2673 = vmatmul.mubr.msk.bf16.vlgmr.msra.gmra.mrb[48].mxu1 %vm354_vm3, %v1809_v4 }
 0xe3c   :  { %2684 = vmatprep.mubr.msk.bf16.mxu1 %vm3299_vm2, %v3298_v16 }
 0xe3d   :  { %2679 = vmatmul.mubr.msk.bf16.vlgmr.msra.gmra.mrb[60].mxu0 %vm354_vm3, %v1810_v5 }
 0xe3e   :  { %2690 = vmatprep.mubr.msk.bf16.mxu0 %vm3299_vm2, %v3298_v16 }
 0xf0e   :  { %v1855_v6 = vpop.f32.mrb[48].mxu1 }
 0xf0f   :  { %v2674_v38 = vpop.f32.mrb[49].mxu1  ;;  %v1907_v49 = vsel %vm354_vm3, %v1855_v6, -inf }
 0xf10   :  { %1908 = vmax.xlane.f32.xlu1 %v1907_v49  ;;  %v1858_v7 = vpop.f32.mrb[50].mxu1  ;;  %v1901_v8 = vpop.f32.mrb[60].mxu0 }
 0xf11   :  { %v2675_v9 = vpop.f32.mrb[51].mxu1  ;;  %v2680_v10 = vpop.f32.mrb[61].mxu0  ;;  %v1910_v11 = vsel %vm354_vm3, %v1901_v8, -inf }
 0xf12   :  { %1911 = vmax.xlane.f32.xlu0 %v1910_v11  ;;  %v1904_v12 = vpop.f32.mrb[62].mxu0 }
 0xf13   :  { %v2681_v13 = vpop.f32.mrb[63].mxu0 }
 0xf21   :  { %1762 = vrot.lane.b32.xlu1 %v3718_v52, %s3302_s7 }
 0xf9d   :  { %v1909_v14 = vpop.xlane.xlu1 %1908 }
 0xf9e   :  { %v1913_v15 = vsub.f32 %v1855_v6, %v1909_v14  ;;  %v2812_v6 = vld [vmem:[#allocation2 + $0x8] sm:$0xff] }
 0xf9f   :  { %v1912_v17 = vpop.xlane.xlu0 %1911 }
 0xfa0   :  { %v1915_v18 = vmul.f32 1.442695, %v1913_v15  ;;  %v1914_v19 = vsub.f32 %v1901_v8, %v1912_v17  ;;  %v2757_v15 = vld [vmem:[#allocation23] sm:$0xff]   ;;  %v2758_v17 = vld [vmem:[#allocation23 + $0x8] sm:$0xff]  }
 0xfa1   :  { %v1763_v20 = vpop.permute.xlu1 %1762 }
 0xfa2   :  { %2795 = vpow2.f32 %v1915_v18  ;;  %v1917_v36 = vmul.f32 1.442695, %v1914_v19  ;;  %v1803_v21 = vadd.f32 %v1802_v45, %v1763_v20  ;;  %v1806_v22 = vadd.f32 %v1805_v48, %v1763_v20  ;;  %v2759_v18 = vld [vmem:[#allocation26] sm:$0xff]   ;;  %v2760_v19 = vld [vmem:[#allocation26 + $0x8] sm:$0xff]  }
 0xfa4   :  { %2797 = vpow2.f32 %v1917_v36  ;;  %v1813_v23 = vpack.c.bf16 %v1803_v21, %v1803_v21  ;;  %v1814_v24 = vpack.c.bf16 %v1806_v22, %v1806_v22 }
 0xfa6   :  { %v1935_v25 = vsel %vm358_vm1, %v1813_v23, 0  ;;  %v1981_v26 = vsel %vm358_vm1, %v1814_v24, 0 }
 0xfa7   :  { %2683 = vmatpush3.bf16.msra.mxu1 %v1935_v25  ;;  %2689 = vmatpush3.bf16.msra.mxu0 %v1981_v26 }
 0xfa8   :  { %2694 = vmatprep.subr.bf16.mxu1 %v3298_v16  ;;  %2700 = vmatprep.subr.bf16.mxu0 %v3298_v16 }
 0xfac   :  { %v2796_v52 = vpop.eup %2795 }
 0xfad   :  { %v1919_v28 = vsel %vm354_vm3, %v2796_v52, 0.0 }
 0xfae   :  { %v2798_v29 = vpop.eup %2797  ;;  %1920 = vadd.xlane.f32.xlu0 %v1919_v28 }
 0xfaf   :  { %v1922_v31 = vsel %vm354_vm3, %v2798_v29, 0.0 }
 0xfb2   :  { %1923 = vadd.xlane.f32.xlu0 %v1922_v31 }
0x103b   :  { %v1921_v32 = vpop.xlane.xlu0 %1920 }
0x103c   :  { %2799 = vrcp.f32 %v1921_v32  ;;  %v2417_v32 = vld [vmem:[#allocation22] ss:$0 sm:$0xff] }
0x103f   :  { %v1924_v33 = vpop.xlane.xlu0 %1923 }
0x1040   :  { %2801 = vrcp.f32 %v1924_v33 }
0x1046   :  { %v2800_v34 = vpop.eup %2799 }
0x1047   :  { %v1927_v35 = vmul.f32 %v2800_v34, %v2796_v52  ;;  %v2416_v52 = vld [vmem:[#allocation20] ss:$0 sm:$0xff] }
0x1049   :  { %v1929_v37 = vpack.c.bf16 %v1927_v35, %v1927_v35 }
0x104a   :  { %v2802_v39 = vpop.eup %2801 }
0x104b   :  { %v1928_v40 = vmul.f32 %v2802_v39, %v2798_v29  ;;  %2685 = vmatmul.mubr.msk.bf16.vlgmr.msra.gmra.mrb[52].mxu1 %vm354_vm3, %v1929_v37  ;;  %v2761_v39 = vld [vmem:[#allocation26 + $0x10] sm:$0xff]  }
0x104c   :  { %2696 = vmatprep.mubr.msk.bf16.mxu1 %vm3299_vm2, %v3298_v16  ;;  %2695 = vmatpush3.bf16.msra.mxu1 %v2029_v44  ;;  %v2765_v44 = vld [vmem:[#allocation26 + $0x30] sm:$0xff]  }
0x104d   :  { %v1930_v41 = vpack.c.bf16 %v1928_v40, %v1928_v40  ;;  %2708 = vmatprep.subr.bf16.mxu1 %v3298_v16  ;;  %v2762_v40 = vld [vmem:[#allocation26 + $0x18] sm:$0xff]  }
0x104f   :  { %2691 = vmatmul.mubr.msk.bf16.vlgmr.msra.gmra.mrb[64].mxu0 %vm354_vm3, %v1930_v41  ;;  %v2763_v41 = vld [vmem:[#allocation26 + $0x20] sm:$0xff]  }
0x1050   :  { %2704 = vmatprep.mubr.msk.bf16.mxu0 %vm3299_vm2, %v3298_v16  ;;  %2701 = vmatpush3.bf16.msra.mxu0 %v2757_v15 }
0x1051   :  { %2702 = vmatprep.subr.bf16.mxu0 %v3298_v16 }
0x1054   :  { %2703 = vmatpush3.bf16.msra.mxu0 %v2758_v17 }
0x111e   :  { %v1971_v45 = vpop.f32.mrb[52].mxu1 }
0x111f   :  { %v2686_v46 = vpop.f32.mrb[53].mxu1 }
0x1120   :  { %v1974_v48 = vpop.f32.mrb[54].mxu1  ;;  %v2418_v46 = vld [vmem:[#allocation25] ss:$0 sm:$0xff] }
0x1121   :  { %v2687_v51 = vpop.f32.mrb[55].mxu1 }
0x1122   :  { %v2017_v53 = vpop.f32.mrb[64].mxu0 }
0x1123   :  { %v2023_v55 = vpack.c.bf16 %v2017_v53, %v1971_v45  ;;  %v2692_v56 = vpop.f32.mrb[65].mxu0  ;;  %v2766_v45 = vld [vmem:[#allocation26 + $0x38] sm:$0xff]  }
0x1124   :  { %v2020_v58 = vpop.f32.mrb[66].mxu0 }
0x1125   :  { %v2693_v59 = vpop.f32.mrb[67].mxu0  ;;  %2697 = vmatmul.mubr.msk.bf16.vlgmr.msra.gmra.mrb[56].mxu1 %vm354_vm3, %v2023_v55 }
0x1126   :  { %2724 = vmatprep.mubr.msk.bf16.mxu1 %vm3299_vm2, %v3298_v16  ;;  %2709 = vmatpush3.bf16.msra.mxu1 %v2759_v18 }
0x1127   :  { %2710 = vmatprep.subr.bf16.mxu1 %v3298_v16 }
0x112a   :  { %2711 = vmatpush3.bf16.msra.mxu1 %v2760_v19 }
0x112b   :  { %2712 = vmatprep.subr.bf16.mxu1 %v3298_v16 }
0x112e   :  { %2713 = vmatpush3.bf16.msra.mxu1 %v2761_v39 }
0x112f   :  { %2714 = vmatprep.subr.bf16.mxu1 %v3298_v16 }
0x1132   :  { %2715 = vmatpush3.bf16.msra.mxu1 %v2762_v40 }
0x1133   :  { %2716 = vmatprep.subr.bf16.mxu1 %v3298_v16 }
0x1136   :  { %2717 = vmatpush3.bf16.msra.mxu1 %v2763_v41 }
0x1137   :  { %2718 = vmatprep.subr.bf16.mxu1 %v3298_v16 }
0x113a   :  { %2719 = vmatpush3.bf16.msra.mxu1 %v2764_v42 }
0x113b   :  { %2720 = vmatprep.subr.bf16.mxu1 %v3298_v16 }
0x113e   :  { %2721 = vmatpush3.bf16.msra.mxu1 %v2765_v44 }
0x113f   :  { %2722 = vmatprep.subr.bf16.mxu1 %v3298_v16 }
0x1142   :  { %2723 = vmatpush3.bf16.msra.mxu1 %v2766_v45 }
0x11f8   :  { %v2065_v60 = vpop.f32.mrb[56].mxu1 }
0x11f9   :  { %v2072_v62 = vadd.f32 %v2065_v60, %v3891_v54  ;;  %v2698_v63 = vpop.f32.mrb[57].mxu1 }
0x11fa   :  { %v2068_v47 = vpop.f32.mrb[58].mxu1 }
0x11fb   :  { %v2081_v50 = vadd.f32 %v2414_v61, %v2072_v62  ;;  %v2073_v0 = vadd.f32 %v2068_v47, %v3894_v57  ;;  %v2699_v1 = vpop.f32.mrb[59].mxu1 }
0x11fd   :  { %v2090_v2 = vmul.f32 %v2415_v43, %v2081_v50  ;;  %v2082_v27 = vadd.f32 %v2414_v61, %v2073_v0 }
0x11ff   :  { %v2091_v3 = vmul.f32 %v2415_v43, %v2082_v27  ;;  %v3929_v4 = vadd.f32 %v2811_v30, %v2090_v2  ;;  %v2422_v2 = vld [vmem:[#allocation28] ss:$0 sm:$0xff] }
0x1201   :  { %v2094_v5 = vsel %vm299_vm0, %v3929_v4, 0.0  ;;  %v3933_v38 = vadd.f32 %v2812_v6, %v2091_v3  ;;  %v2431_v3 = vld [vmem:[#allocation31] ss:$0 sm:$0xff] }
0x1202   :  { %2095 = vadd.xlane.f32.xlu0 %v2094_v5 }
0x1203   :  { %v2097_v54 = vsel %vm299_vm0, %v3933_v38, 0.0 }
0x1206   :  { %2098 = vadd.xlane.f32.xlu0 %v2097_v54 }
0x128f   :  { %v2096_v49 = vpop.xlane.xlu0 %2095 }
0x1290   :  { %v2100_v57 = vmul.f32 0.03125, %v2096_v49 }
0x1292   :  { %v2102_v7 = vsub.f32 %v3929_v4, %v2100_v57 }
0x1293   :  { %v2099_v8 = vpop.xlane.xlu0 %2098 }
0x1294   :  { %v2101_v9 = vmul.f32 0.03125, %v2099_v8  ;;  %v2104_v10 = vmul.f32 %v2102_v7, %v2102_v7 }
0x1296   :  { %v2103_v11 = vsub.f32 %v3933_v38, %v2101_v9  ;;  %v2106_v12 = vsel %vm299_vm0, %v2104_v10, 0.0 }
0x1297   :  { %2107 = vadd.xlane.f32.xlu0 %v2106_v12 }
0x1298   :  { %v2105_v13 = vmul.f32 %v2103_v11, %v2103_v11 }
0x129a   :  { %v2109_v14 = vsel %vm299_vm0, %v2105_v13, 0.0 }
0x129b   :  { %2110 = vadd.xlane.f32.xlu0 %v2109_v14 }
0x1324   :  { %v2108_v20 = vpop.xlane.xlu0 %2107 }
0x1325   :  { %v2112_v36 = vmul.f32 0.03125, %v2108_v20 }
0x1327   :  { %v2114_v21 = vadd.f32 1e-05, %v2112_v36 }
0x1328   :  { %v2111_v22 = vpop.xlane.xlu0 %2110 }
0x1329   :  { %2803 = vrsqrt.f32 %v2114_v21  ;;  %v2113_v23 = vmul.f32 0.03125, %v2111_v22 }
0x132b   :  { %v2115_v24 = vadd.f32 1e-05, %v2113_v23 }
0x132d   :  { %2805 = vrsqrt.f32 %v2115_v24 }
0x1333   :  { %v2804_v25 = vpop.eup %2803 }
0x1334   :  { %v2118_v26 = vmul.f32 %v2804_v25, %v2102_v7 }
0x1336   :  { %v2127_v29 = vmul.f32 %v2416_v52, %v2118_v26 }
0x1337   :  { %v2806_v28 = vpop.eup %2805 }
0x1338   :  { %v2119_v31 = vmul.f32 %v2806_v28, %v2103_v11  ;;  %v2136_v34 = vadd.f32 %v2417_v32, %v2127_v29 }
0x133a   :  { %v2128_v33 = vmul.f32 %v2416_v52, %v2119_v31 }
0x133c   :  { %v2137_v35 = vadd.f32 %v2417_v32, %v2128_v33 }
0x133e   :  { %v2138_v37 = vpack.c.bf16 %v2137_v35, %v2136_v34 }
0x1340   :  { %2705 = vmatmul.mubr.msk.bf16.vlgmr.msra.gmra.mrb[68].mxu0 %vm299_vm0, %v2138_v37 }
0x1413   :  { %v2199_v48 = vpop.f32.mrb[68].mxu0 }
0x1414   :  { %v2200_v51 = vadd.f32 %v2418_v46, %v2199_v48  ;;  %v2706_v53 = vpop.f32.mrb[69].mxu0 }
0x1415   :  { %v2202_v55 = vpop.f32.mrb[70].mxu0 }
0x1416   :  { %v2208_v56 = vmul.f32 0.70710677, %v2200_v51  ;;  %v2203_v58 = vadd.f32 %v2418_v46, %v2202_v55  ;;  %v2707_v59 = vpop.f32.mrb[71].mxu0  ;;  %v2206_v43 = vmul.f32 0.5, %v2200_v51 }
0x1418   :  { %2807 = verf.f32 %v2208_v56  ;;  %v2209_v60 = vmul.f32 0.70710677, %v2203_v58  ;;  %v2207_v47 = vmul.f32 0.5, %v2203_v58 }
0x141a   :  { %2809 = verf.f32 %v2209_v60 }
0x1422   :  { %v2808_v61 = vpop.eup %2807 }
0x1423   :  { %v2212_v62 = vadd.f32 1.0, %v2808_v61 }
0x1424   :  { %v2810_v63 = vpop.eup %2809 }
0x1425   :  { %v2213_v50 = vadd.f32 1.0, %v2810_v63  ;;  %v2214_v16 = vmul.f32 %v2212_v62, %v2206_v43 }
0x1427   :  { %v2215_v0 = vmul.f32 %v2213_v50, %v2207_v47 }
0x1429   :  { %v2216_v1 = vpack.c.bf16 %v2215_v0, %v2214_v16 }
0x142b   :  { %2725 = vmatmul.mubr.bf16.vlgmr.msra.gmra.mrb[60].mxu1 %v2216_v1 }
0x14fe   :  { %v2322_v27 = vpop.f32.mrb[60].mxu1 }
0x14ff   :  { %v2323_v30 = vadd.f32 %v2422_v2, %v2322_v27  ;;  %v2726_v5 = vpop.f32.mrb[61].mxu1 }
0x1500   :  { %v2325_v6 = vpop.f32.mrb[62].mxu1 }
0x1501   :  { %v2336_v54 = vmul.f32 %v2431_v3, %v2323_v30  ;;  %v2326_v49 = vadd.f32 %v2422_v2, %v2325_v6  ;;  %v2727_v57 = vpop.f32.mrb[63].mxu1 }
0x1503   :  { %v2338_v7 = vadd.f32 %v2336_v54, %v3929_v4  ;;  %v2337_v8 = vmul.f32 %v2431_v3, %v2326_v49 }
0x1505   :  { %2340 = vst.msk [vmem:[#allocation32] sm:$0xff] %vm299_vm0, %v2338_v7  ;;  %v2339_v9 = vadd.f32 %v2337_v8, %v3933_v38 }
0x1507   :  { %2341 = vst.msk [vmem:[#allocation32 + $0x8] sm:$0xff] %vm299_vm0, %v2339_v9 }
0x1508   :  { %3242 = shalt.err (!%p3239_p2)
}
0x1509   :  { %s4006_s22 = sld [smem:[#allocation49_spill]] }
0x150f   :  { %s3243_s29 = scalar_lea.hbm %s4006_s22, 256 }
0x1510   :  { %p3244_p3 = scmp.ne.s32.totalorder %s4006_s22, %s3243_s29  ;;  %p3247_p4 = scmp.lt.u32.totalorder %s3243_s29, %s4006_s22 }
0x1512   :  { %p3249_p5 = pnand %p3247_p4, %p3244_p3 }
0x1514   :  { %3252 = shalt.err (!%p3249_p5)
}
0x1515   :  { %2353 = dma.vmem_to_hbm [thread:$0]  %s2348_s23, 256, %s4006_s22, [#allocation4], %s3287_s17, %s3287_s17, %s3288_s3  }
0x1516   :  { %3273 = dma.done.wait [#allocation4], 256  }
0x1517   :  { %3274 = vsyncadd [#allocation4], 4294967040 }
0x1518   :  { %2357 = vsyncpa [#allocation3], 1 }
0x1519   :  { %2358 = vsyncpa [#allocation6], 1 }
0x151a   :  { %2359 = vsyncpa [#allocation9], 1 }
0x151b   :  { %2360 = vsyncpa [#allocation12], 1 }
0x151c   :  { %2361 = vsyncpa [#allocation15], 1 }
0x151d   :  { %2362 = vsyncpa [#allocation18], 1 }
0x151e   :  { %2363 = vsyncpa [#allocation21], 1 }
0x151f   :  { %2364 = vsyncpa [#allocation24], 1 }
0x1520   :  { %2365 = vsyncpa [#allocation27], 1 }
0x1521   :  { %2366 = vsyncpa [#allocation30], 1 }
0x1522   :  { %2367 = vsyncpa [#allocation4], 1 }

</bundles_post_ra>
